<compile_context>
chip_gen: v5e
topology: v5e:2x2
jax: 0.10.0
libtpu: 0.0.40
codegen_flags: <defaults>
</compile_context>

<pallas_src>
import functools

import jax
import jax.numpy as jnp
import numpy as np
from jax.experimental import pallas as pl
from jax.experimental.pallas import tpu as pltpu

# ---- "opt" hyper-parameters (small, deterministic, consistent with a capsule layer) ----
IN_CAPS = 8      # number of input capsules
IN_DIM = 32      # input capsule dimension
NUM_CAPS = 4     # number of output capsules (e.g. relation classes)
DIM_CAPS = 16    # output capsule dimension
NUM_ROUTING = 3  # routing iterations
EPS = 1e-8


def _round_up(x, m):
    return ((x + m - 1) // m) * m


def _squash(s, eps=EPS):
    # Reference helper: squash(s) = (|s|^2 / (1 + |s|^2)) * s / |s|  (capsule dim last)
    sq = jnp.sum(s * s, axis=-1, keepdims=True)
    return (sq / (1.0 + sq)) * s * jax.lax.rsqrt(sq + eps)


def capsule_kernel(x_ref, w_ref, out_ref):
    # x_ref:   (IN_CAPS, IN_DIM, TILE_B)              bf16, batch lives in lanes
    # w_ref:   (IN_CAPS, NUM_CAPS*DIM_CAPS, IN_DIM)   bf16, VMEM-resident (constant index_map)
    # out_ref: (NUM_CAPS, TILE_B)                     f32, lane-dense per-capsule L2 norms
    x = x_ref[...]
    W = w_ref[...]

    # u_hat[i, j*D+d, t] = sum_k W[i, j*D+d, k] * x[i, k, t]
    # -> IN_CAPS small bf16 (64 x 32) . (32 x TILE_B) MXU matmuls, f32 accumulation.
    u_hat = jax.lax.dot_general(
        W, x,
        dimension_numbers=(((2,), (1,)), ((0,), (0,))),
        preferred_element_type=jnp.float32,
    )                                                    # [I, J*D, T] f32

    # Per-output-capsule views (static, sublane-aligned slices; NUM_CAPS is tiny,
    # so routing is fully unrolled in Python over j).
    u = [u_hat[:, j * DIM_CAPS:(j + 1) * DIM_CAPS, :] for j in range(NUM_CAPS)]  # [I, D, T]

    def squash_scale(sq):
        # ||squash(s)|| / ||s|| = (sq/(1+sq)) * rsqrt(sq+eps); shared approx recip on the EUP.
        return sq * pl.reciprocal(1.0 + sq, approx=True) * jax.lax.rsqrt(sq + EPS)

    # ---- routing iteration 0: b == 0  =>  c == 1/NUM_CAPS, softmax skipped ----
    s = [jnp.sum(u[j], axis=0) * (1.0 / NUM_CAPS) for j in range(NUM_CAPS)]       # [D, T]
    # b_j[i,t] = u_j[i] . v_j = scale_j * (u_j[i] . s_j)   (v never materialised)
    b = []
    for j in range(NUM_CAPS):
        sq = jnp.sum(s[j] * s[j], axis=0, keepdims=True)                          # [1, T]
        dot_us = jnp.sum(u[j] * s[j][None, :, :], axis=1)                         # [I, T]
        b.append(squash_scale(sq) * dot_us)

    # ---- routing iterations 1 .. NUM_ROUTING-1 ----
    for r in range(1, NUM_ROUTING):
        # softmax over output capsules j (torch dim=1): elementwise over NUM_CAPS [I, T] logits
        m = b[0]
        for j in range(1, NUM_CAPS):
            m = jnp.maximum(m, b[j])
        e = [jnp.exp(b[j] - m) for j in range(NUM_CAPS)]
        denom = e[0]
        for j in range(1, NUM_CAPS):
            denom = denom + e[j]
        inv_denom = pl.reciprocal(denom, approx=True)      # one EUP recip shared by all j
        c = [e[j] * inv_denom for j in range(NUM_CAPS)]                            # [I, T]

        # s_j[d, t] = sum_i c_j[i, t] * u_j[i, d, t]   (major-axis adds, pure VPU)
        s = [jnp.sum(c[j][:, None, :] * u[j], axis=0) for j in range(NUM_CAPS)]    # [D, T]

        if r < NUM_ROUTING - 1:
            for j in range(NUM_CAPS):
                sq = jnp.sum(s[j] * s[j], axis=0, keepdims=True)
                dot_us = jnp.sum(u[j] * s[j][None, :, :], axis=1)
                b[j] = b[j] + squash_scale(sq) * dot_us

    # ---- epilogue: ||squash(s_j)|| without materialising v ----
    # ||v|| = (sq/(1+sq)) * sqrt(sq) * rsqrt(sq+eps)   (algebraically identical)
    sq_rows = [jnp.sum(s[j] * s[j], axis=0, keepdims=True) for j in range(NUM_CAPS)]
    sq = jnp.concatenate(sq_rows, axis=0)                 # [J, T]
    out_ref[...] = (sq * pl.reciprocal(1.0 + sq, approx=True)
                    * jnp.sqrt(sq) * jax.lax.rsqrt(sq + EPS))


@functools.partial(jax.jit, static_argnums=(2,))
def _capsule_network_impl(x, W, tile_b):
    B = x.shape[0]
    b_pad = _round_up(B, tile_b)

    # Batch into the lane dimension; bf16 halves the x DMA (accumulation stays f32).
    xt = jnp.transpose(x.astype(jnp.bfloat16), (1, 2, 0))          # [I, K, B]
    if b_pad != B:
        xt = jnp.pad(xt, ((0, 0), (0, 0), (0, b_pad - B)))
    # W: [j, i, d, k] -> [i, j*d, k] so u_hat is a single batched-over-i matmul.
    Wt = jnp.transpose(W.astype(jnp.bfloat16), (1, 0, 2, 3)).reshape(
        IN_CAPS, NUM_CAPS * DIM_CAPS, IN_DIM)

    grid = (b_pad // tile_b,)
    out = pl.pallas_call(
        capsule_kernel,
        out_shape=jax.ShapeDtypeStruct((NUM_CAPS, b_pad), jnp.float32),
        grid=grid,
        in_specs=[
            pl.BlockSpec((IN_CAPS, IN_DIM, tile_b), lambda g: (0, 0, g)),
            # Constant index_map + full block: W (32 KiB bf16) is fetched once and
            # stays resident in VMEM across all batch tiles.
            pl.BlockSpec((IN_CAPS, NUM_CAPS * DIM_CAPS, IN_DIM), lambda g: (0, 0, 0)),
        ],
        out_specs=pl.BlockSpec((NUM_CAPS, tile_b), lambda g: (0, g)),
        compiler_params=pltpu.CompilerParams(
            dimension_semantics=("parallel",)),   # batch tiles shard across the 2 TCs on v7x
    )(xt, Wt)
    return jnp.transpose(out[:, :B])              # [B, NUM_CAPS]


def _pick_tile_b(B):
    """Lane-dense batch tile: multiple of 128, >=2 grid steps once B >= 256 (so the
    'parallel' grid axis can use both v7x TensorCores), capped at 1024 lanes so the
    per-step footprint (~4 MiB incl. double buffering) fits v5e's 16 MiB scoped VMEM."""
    b128 = _round_up(max(B, 1), 128)
    if b128 <= 128:
        return 128
    return min(1024, _round_up((b128 + 1) // 2, 128))


def capsule_network(x, W, *, tile_b=None):
    """x: [B, IN_CAPS, IN_DIM]; W: [NUM_CAPS, IN_CAPS, DIM_CAPS, IN_DIM].
    Returns [B, NUM_CAPS] = ||v_j||_2 (CapsuleNetwork.forward)."""
    B = x.shape[0]
    if tile_b is None:
        tile_b = _pick_tile_b(B)
    return _capsule_network_impl(x, W, tile_b)


def capsule_network_ref(x, W):
    # Pure-JAX f32 reference (same math, canonical layout) for a sanity check.
    u_hat = jnp.einsum("jidk,bik->bjid", W, x, precision="highest")
    B = x.shape[0]
    b = jnp.zeros((B, NUM_CAPS, IN_CAPS), jnp.float32)
    v = None
    for r in range(NUM_ROUTING):
        c = jax.nn.softmax(b, axis=1)     # softmax over output capsules (torch dim=1)
        s = jnp.einsum("bji,bjid->bjd", c, u_hat, precision="highest")
        v = _squash(s)
        if r < NUM_ROUTING - 1:
            b = b + jnp.einsum("bjid,bjd->bji", u_hat, v, precision="highest")
    return jnp.sqrt(jnp.sum(v * v, axis=-1))


if __name__ == "__main__":
    key = jax.random.PRNGKey(0)
    kx, kw = jax.random.split(key)
    # Deterministic parameter init (0.01 * N(0,1)), as in typical Capsule __init__.
    W = 0.01 * jax.random.normal(kw, (NUM_CAPS, IN_CAPS, DIM_CAPS, IN_DIM), jnp.float32)

    # Tolerance loosened vs. the pure-f32 version because x/W are fed to the MXU in
    # bf16 (per the performance review); routing math itself is f32.
    RTOL, ATOL = 3e-2, 2e-4

    # Case 1: tiny batch (single grid step).
    B = 4
    x = jax.random.normal(kx, (B, IN_CAPS, IN_DIM), jnp.float32)
    out = jax.block_until_ready(capsule_network(x, W))
    ref = capsule_network_ref(x, W)
    np.testing.assert_allclose(np.asarray(out), np.asarray(ref), rtol=RTOL, atol=ATOL)

    # Case 2: non-multiple-of-128 batch -> padding + a 2-step 'parallel' grid
    # (the megacore-relevant path on v7x).
    B2 = 300
    x2 = jax.random.normal(jax.random.PRNGKey(1), (B2, IN_CAPS, IN_DIM), jnp.float32)
    out2 = jax.block_until_ready(capsule_network(x2, W))
    ref2 = capsule_network_ref(x2, W)
    np.testing.assert_allclose(np.asarray(out2), np.asarray(ref2), rtol=RTOL, atol=ATOL)

    print("KERNEL_OK")
</pallas_src>

<mosaic_0001>
module attributes {stable_mosaic.version = 11 : i64} {
  func.func @capsule_kernel(%arg0: i32, %arg1: memref<8x32x128xbf16, #tpu.memory_space<vmem>>, %arg2: memref<8x64x32xbf16, #tpu.memory_space<vmem>>, %arg3: memref<4x128xf32, #tpu.memory_space<vmem>>) attributes {dimension_semantics = [#tpu.dimension_semantics<parallel>], iteration_bounds = array<i64: 1>, scalar_prefetch = 0 : i64, scratch_operands = 0 : i64, tpu.core_type = #tpu.core_type<tc>, window_params = [{transform_indices = @transform_0, window_bounds = array<i64: 8, 32, 128>}, {pipeline_mode = #tpu.pipeline_mode<synchronous>, transform_indices = @transform_1, window_bounds = array<i64: 8, 64, 32>}, {transform_indices = @transform_2, window_bounds = array<i64: 4, 128>}]} {
    %c0 = arith.constant 0 : index
    %c0_0 = arith.constant 0 : index
    %c0_1 = arith.constant 0 : index
    %0 = vector.load %arg1[%c0, %c0_0, %c0_1] : memref<8x32x128xbf16, #tpu.memory_space<vmem>>, vector<8x32x128xbf16>
    %c0_2 = arith.constant 0 : index
    %c0_3 = arith.constant 0 : index
    %c0_4 = arith.constant 0 : index
    %1 = vector.load %arg2[%c0_2, %c0_3, %c0_4] : memref<8x64x32xbf16, #tpu.memory_space<vmem>>, vector<8x64x32xbf16>
    %cst = arith.constant dense<0.000000e+00> : vector<8x64x128xf32>
    %2 = tpu.matmul %1, %0, %cst {dimension_numbers = #tpu.dot_dimension_numbers<[2], [1], [1], [2], [0, 0, 0, 1, 1, 2], [0], [0]>} : vector<8x64x32xbf16>, vector<8x32x128xbf16>, vector<8x64x128xf32> -> vector<8x64x128xf32>
    %3 = vector.extract_strided_slice %2 {offsets = [0, 0, 0], sizes = [8, 16, 128], strides = [1, 1, 1]} : vector<8x64x128xf32> to vector<8x16x128xf32>
    %4 = vector.extract_strided_slice %2 {offsets = [0, 16, 0], sizes = [8, 16, 128], strides = [1, 1, 1]} : vector<8x64x128xf32> to vector<8x16x128xf32>
    %5 = vector.extract_strided_slice %2 {offsets = [0, 32, 0], sizes = [8, 16, 128], strides = [1, 1, 1]} : vector<8x64x128xf32> to vector<8x16x128xf32>
    %6 = vector.extract_strided_slice %2 {offsets = [0, 48, 0], sizes = [8, 16, 128], strides = [1, 1, 1]} : vector<8x64x128xf32> to vector<8x16x128xf32>
    %cst_5 = arith.constant dense<0.000000e+00> : vector<16x128xf32>
    %7 = vector.multi_reduction <add>, %3, %cst_5 [0] : vector<8x16x128xf32> to vector<16x128xf32>
    %cst_6 = arith.constant 2.500000e-01 : f32
    %8 = vector.broadcast %cst_6 : f32 to vector<16x128xf32>
    %9 = arith.mulf %7, %8 : vector<16x128xf32>
    %cst_7 = arith.constant dense<0.000000e+00> : vector<16x128xf32>
    %10 = vector.multi_reduction <add>, %4, %cst_7 [0] : vector<8x16x128xf32> to vector<16x128xf32>
    %cst_8 = arith.constant 2.500000e-01 : f32
    %11 = vector.broadcast %cst_8 : f32 to vector<16x128xf32>
    %12 = arith.mulf %10, %11 : vector<16x128xf32>
    %cst_9 = arith.constant dense<0.000000e+00> : vector<16x128xf32>
    %13 = vector.multi_reduction <add>, %5, %cst_9 [0] : vector<8x16x128xf32> to vector<16x128xf32>
    %cst_10 = arith.constant 2.500000e-01 : f32
    %14 = vector.broadcast %cst_10 : f32 to vector<16x128xf32>
    %15 = arith.mulf %13, %14 : vector<16x128xf32>
    %cst_11 = arith.constant dense<0.000000e+00> : vector<16x128xf32>
    %16 = vector.multi_reduction <add>, %6, %cst_11 [0] : vector<8x16x128xf32> to vector<16x128xf32>
    %cst_12 = arith.constant 2.500000e-01 : f32
    %17 = vector.broadcast %cst_12 : f32 to vector<16x128xf32>
    %18 = arith.mulf %16, %17 : vector<16x128xf32>
    %19 = arith.mulf %9, %9 : vector<16x128xf32>
    %cst_13 = arith.constant dense<0.000000e+00> : vector<128xf32>
    %20 = vector.multi_reduction <add>, %19, %cst_13 [0] : vector<16x128xf32> to vector<128xf32>
    %21 = vector.shape_cast %20 : vector<128xf32> to vector<1x128xf32>
    %22 = vector.shape_cast %9 : vector<16x128xf32> to vector<1x16x128xf32>
    %23 = vector.broadcast %22 : vector<1x16x128xf32> to vector<8x16x128xf32>
    %24 = arith.mulf %3, %23 : vector<8x16x128xf32>
    %cst_14 = arith.constant dense<0.000000e+00> : vector<8x128xf32>
    %25 = vector.multi_reduction <add>, %24, %cst_14 [1] : vector<8x16x128xf32> to vector<8x128xf32>
    %cst_15 = arith.constant 1.000000e+00 : f32
    %26 = vector.broadcast %cst_15 : f32 to vector<1x128xf32>
    %27 = arith.addf %26, %21 : vector<1x128xf32>
    %28 = tpu.reciprocal %27 {approx = true} : vector<1x128xf32> -> vector<1x128xf32>
    %29 = arith.mulf %21, %28 : vector<1x128xf32>
    %cst_16 = arith.constant 9.99999993E-9 : f32
    %30 = vector.broadcast %cst_16 : f32 to vector<1x128xf32>
    %31 = arith.addf %21, %30 : vector<1x128xf32>
    %32 = math.rsqrt %31 : vector<1x128xf32>
    %33 = arith.mulf %29, %32 : vector<1x128xf32>
    %34 = vector.broadcast %33 : vector<1x128xf32> to vector<8x128xf32>
    %35 = arith.mulf %34, %25 : vector<8x128xf32>
    %36 = arith.mulf %12, %12 : vector<16x128xf32>
    %cst_17 = arith.constant dense<0.000000e+00> : vector<128xf32>
    %37 = vector.multi_reduction <add>, %36, %cst_17 [0] : vector<16x128xf32> to vector<128xf32>
    %38 = vector.shape_cast %37 : vector<128xf32> to vector<1x128xf32>
    %39 = vector.shape_cast %12 : vector<16x128xf32> to vector<1x16x128xf32>
    %40 = vector.broadcast %39 : vector<1x16x128xf32> to vector<8x16x128xf32>
    %41 = arith.mulf %4, %40 : vector<8x16x128xf32>
    %cst_18 = arith.constant dense<0.000000e+00> : vector<8x128xf32>
    %42 = vector.multi_reduction <add>, %41, %cst_18 [1] : vector<8x16x128xf32> to vector<8x128xf32>
    %cst_19 = arith.constant 1.000000e+00 : f32
    %43 = vector.broadcast %cst_19 : f32 to vector<1x128xf32>
    %44 = arith.addf %43, %38 : vector<1x128xf32>
    %45 = tpu.reciprocal %44 {approx = true} : vector<1x128xf32> -> vector<1x128xf32>
    %46 = arith.mulf %38, %45 : vector<1x128xf32>
    %cst_20 = arith.constant 9.99999993E-9 : f32
    %47 = vector.broadcast %cst_20 : f32 to vector<1x128xf32>
    %48 = arith.addf %38, %47 : vector<1x128xf32>
    %49 = math.rsqrt %48 : vector<1x128xf32>
    %50 = arith.mulf %46, %49 : vector<1x128xf32>
    %51 = vector.broadcast %50 : vector<1x128xf32> to vector<8x128xf32>
    %52 = arith.mulf %51, %42 : vector<8x128xf32>
    %53 = arith.mulf %15, %15 : vector<16x128xf32>
    %cst_21 = arith.constant dense<0.000000e+00> : vector<128xf32>
    %54 = vector.multi_reduction <add>, %53, %cst_21 [0] : vector<16x128xf32> to vector<128xf32>
    %55 = vector.shape_cast %54 : vector<128xf32> to vector<1x128xf32>
    %56 = vector.shape_cast %15 : vector<16x128xf32> to vector<1x16x128xf32>
    %57 = vector.broadcast %56 : vector<1x16x128xf32> to vector<8x16x128xf32>
    %58 = arith.mulf %5, %57 : vector<8x16x128xf32>
    %cst_22 = arith.constant dense<0.000000e+00> : vector<8x128xf32>
    %59 = vector.multi_reduction <add>, %58, %cst_22 [1] : vector<8x16x128xf32> to vector<8x128xf32>
    %cst_23 = arith.constant 1.000000e+00 : f32
    %60 = vector.broadcast %cst_23 : f32 to vector<1x128xf32>
    %61 = arith.addf %60, %55 : vector<1x128xf32>
    %62 = tpu.reciprocal %61 {approx = true} : vector<1x128xf32> -> vector<1x128xf32>
    %63 = arith.mulf %55, %62 : vector<1x128xf32>
    %cst_24 = arith.constant 9.99999993E-9 : f32
    %64 = vector.broadcast %cst_24 : f32 to vector<1x128xf32>
    %65 = arith.addf %55, %64 : vector<1x128xf32>
    %66 = math.rsqrt %65 : vector<1x128xf32>
    %67 = arith.mulf %63, %66 : vector<1x128xf32>
    %68 = vector.broadcast %67 : vector<1x128xf32> to vector<8x128xf32>
    %69 = arith.mulf %68, %59 : vector<8x128xf32>
    %70 = arith.mulf %18, %18 : vector<16x128xf32>
    %cst_25 = arith.constant dense<0.000000e+00> : vector<128xf32>
    %71 = vector.multi_reduction <add>, %70, %cst_25 [0] : vector<16x128xf32> to vector<128xf32>
    %72 = vector.shape_cast %71 : vector<128xf32> to vector<1x128xf32>
    %73 = vector.shape_cast %18 : vector<16x128xf32> to vector<1x16x128xf32>
    %74 = vector.broadcast %73 : vector<1x16x128xf32> to vector<8x16x128xf32>
    %75 = arith.mulf %6, %74 : vector<8x16x128xf32>
    %cst_26 = arith.constant dense<0.000000e+00> : vector<8x128xf32>
    %76 = vector.multi_reduction <add>, %75, %cst_26 [1] : vector<8x16x128xf32> to vector<8x128xf32>
    %cst_27 = arith.constant 1.000000e+00 : f32
    %77 = vector.broadcast %cst_27 : f32 to vector<1x128xf32>
    %78 = arith.addf %77, %72 : vector<1x128xf32>
    %79 = tpu.reciprocal %78 {approx = true} : vector<1x128xf32> -> vector<1x128xf32>
    %80 = arith.mulf %72, %79 : vector<1x128xf32>
    %cst_28 = arith.constant 9.99999993E-9 : f32
    %81 = vector.broadcast %cst_28 : f32 to vector<1x128xf32>
    %82 = arith.addf %72, %81 : vector<1x128xf32>
    %83 = math.rsqrt %82 : vector<1x128xf32>
    %84 = arith.mulf %80, %83 : vector<1x128xf32>
    %85 = vector.broadcast %84 : vector<1x128xf32> to vector<8x128xf32>
    %86 = arith.mulf %85, %76 : vector<8x128xf32>
    %87 = arith.maximumf %35, %52 : vector<8x128xf32>
    %88 = arith.maximumf %87, %69 : vector<8x128xf32>
    %89 = arith.maximumf %88, %86 : vector<8x128xf32>
    %90 = arith.subf %35, %89 : vector<8x128xf32>
    %91 = math.exp %90 : vector<8x128xf32>
    %92 = arith.subf %52, %89 : vector<8x128xf32>
    %93 = math.exp %92 : vector<8x128xf32>
    %94 = arith.subf %69, %89 : vector<8x128xf32>
    %95 = math.exp %94 : vector<8x128xf32>
    %96 = arith.subf %86, %89 : vector<8x128xf32>
    %97 = math.exp %96 : vector<8x128xf32>
    %98 = arith.addf %91, %93 : vector<8x128xf32>
    %99 = arith.addf %98, %95 : vector<8x128xf32>
    %100 = arith.addf %99, %97 : vector<8x128xf32>
    %101 = tpu.reciprocal %100 {approx = true} : vector<8x128xf32> -> vector<8x128xf32>
    %102 = arith.mulf %91, %101 : vector<8x128xf32>
    %103 = arith.mulf %93, %101 : vector<8x128xf32>
    %104 = arith.mulf %95, %101 : vector<8x128xf32>
    %105 = arith.mulf %97, %101 : vector<8x128xf32>
    %106 = vector.shape_cast %102 : vector<8x128xf32> to vector<8x1x128xf32>
    %107 = vector.broadcast %106 : vector<8x1x128xf32> to vector<8x16x128xf32>
    %108 = arith.mulf %107, %3 : vector<8x16x128xf32>
    %cst_29 = arith.constant dense<0.000000e+00> : vector<16x128xf32>
    %109 = vector.multi_reduction <add>, %108, %cst_29 [0] : vector<8x16x128xf32> to vector<16x128xf32>
    %110 = vector.shape_cast %103 : vector<8x128xf32> to vector<8x1x128xf32>
    %111 = vector.broadcast %110 : vector<8x1x128xf32> to vector<8x16x128xf32>
    %112 = arith.mulf %111, %4 : vector<8x16x128xf32>
    %cst_30 = arith.constant dense<0.000000e+00> : vector<16x128xf32>
    %113 = vector.multi_reduction <add>, %112, %cst_30 [0] : vector<8x16x128xf32> to vector<16x128xf32>
    %114 = vector.shape_cast %104 : vector<8x128xf32> to vector<8x1x128xf32>
    %115 = vector.broadcast %114 : vector<8x1x128xf32> to vector<8x16x128xf32>
    %116 = arith.mulf %115, %5 : vector<8x16x128xf32>
    %cst_31 = arith.constant dense<0.000000e+00> : vector<16x128xf32>
    %117 = vector.multi_reduction <add>, %116, %cst_31 [0] : vector<8x16x128xf32> to vector<16x128xf32>
    %118 = vector.shape_cast %105 : vector<8x128xf32> to vector<8x1x128xf32>
    %119 = vector.broadcast %118 : vector<8x1x128xf32> to vector<8x16x128xf32>
    %120 = arith.mulf %119, %6 : vector<8x16x128xf32>
    %cst_32 = arith.constant dense<0.000000e+00> : vector<16x128xf32>
    %121 = vector.multi_reduction <add>, %120, %cst_32 [0] : vector<8x16x128xf32> to vector<16x128xf32>
    %122 = arith.mulf %109, %109 : vector<16x128xf32>
    %cst_33 = arith.constant dense<0.000000e+00> : vector<128xf32>
    %123 = vector.multi_reduction <add>, %122, %cst_33 [0] : vector<16x128xf32> to vector<128xf32>
    %124 = vector.shape_cast %123 : vector<128xf32> to vector<1x128xf32>
    %125 = vector.shape_cast %109 : vector<16x128xf32> to vector<1x16x128xf32>
    %126 = vector.broadcast %125 : vector<1x16x128xf32> to vector<8x16x128xf32>
    %127 = arith.mulf %3, %126 : vector<8x16x128xf32>
    %cst_34 = arith.constant dense<0.000000e+00> : vector<8x128xf32>
    %128 = vector.multi_reduction <add>, %127, %cst_34 [1] : vector<8x16x128xf32> to vector<8x128xf32>
    %cst_35 = arith.constant 1.000000e+00 : f32
    %129 = vector.broadcast %cst_35 : f32 to vector<1x128xf32>
    %130 = arith.addf %129, %124 : vector<1x128xf32>
    %131 = tpu.reciprocal %130 {approx = true} : vector<1x128xf32> -> vector<1x128xf32>
    %132 = arith.mulf %124, %131 : vector<1x128xf32>
    %cst_36 = arith.constant 9.99999993E-9 : f32
    %133 = vector.broadcast %cst_36 : f32 to vector<1x128xf32>
    %134 = arith.addf %124, %133 : vector<1x128xf32>
    %135 = math.rsqrt %134 : vector<1x128xf32>
    %136 = arith.mulf %132, %135 : vector<1x128xf32>
    %137 = vector.broadcast %136 : vector<1x128xf32> to vector<8x128xf32>
    %138 = arith.mulf %137, %128 : vector<8x128xf32>
    %139 = arith.addf %35, %138 : vector<8x128xf32>
    %140 = arith.mulf %113, %113 : vector<16x128xf32>
    %cst_37 = arith.constant dense<0.000000e+00> : vector<128xf32>
    %141 = vector.multi_reduction <add>, %140, %cst_37 [0] : vector<16x128xf32> to vector<128xf32>
    %142 = vector.shape_cast %141 : vector<128xf32> to vector<1x128xf32>
    %143 = vector.shape_cast %113 : vector<16x128xf32> to vector<1x16x128xf32>
    %144 = vector.broadcast %143 : vector<1x16x128xf32> to vector<8x16x128xf32>
    %145 = arith.mulf %4, %144 : vector<8x16x128xf32>
    %cst_38 = arith.constant dense<0.000000e+00> : vector<8x128xf32>
    %146 = vector.multi_reduction <add>, %145, %cst_38 [1] : vector<8x16x128xf32> to vector<8x128xf32>
    %cst_39 = arith.constant 1.000000e+00 : f32
    %147 = vector.broadcast %cst_39 : f32 to vector<1x128xf32>
    %148 = arith.addf %147, %142 : vector<1x128xf32>
    %149 = tpu.reciprocal %148 {approx = true} : vector<1x128xf32> -> vector<1x128xf32>
    %150 = arith.mulf %142, %149 : vector<1x128xf32>
    %cst_40 = arith.constant 9.99999993E-9 : f32
    %151 = vector.broadcast %cst_40 : f32 to vector<1x128xf32>
    %152 = arith.addf %142, %151 : vector<1x128xf32>
    %153 = math.rsqrt %152 : vector<1x128xf32>
    %154 = arith.mulf %150, %153 : vector<1x128xf32>
    %155 = vector.broadcast %154 : vector<1x128xf32> to vector<8x128xf32>
    %156 = arith.mulf %155, %146 : vector<8x128xf32>
    %157 = arith.addf %52, %156 : vector<8x128xf32>
    %158 = arith.mulf %117, %117 : vector<16x128xf32>
    %cst_41 = arith.constant dense<0.000000e+00> : vector<128xf32>
    %159 = vector.multi_reduction <add>, %158, %cst_41 [0] : vector<16x128xf32> to vector<128xf32>
    %160 = vector.shape_cast %159 : vector<128xf32> to vector<1x128xf32>
    %161 = vector.shape_cast %117 : vector<16x128xf32> to vector<1x16x128xf32>
    %162 = vector.broadcast %161 : vector<1x16x128xf32> to vector<8x16x128xf32>
    %163 = arith.mulf %5, %162 : vector<8x16x128xf32>
    %cst_42 = arith.constant dense<0.000000e+00> : vector<8x128xf32>
    %164 = vector.multi_reduction <add>, %163, %cst_42 [1] : vector<8x16x128xf32> to vector<8x128xf32>
    %cst_43 = arith.constant 1.000000e+00 : f32
    %165 = vector.broadcast %cst_43 : f32 to vector<1x128xf32>
    %166 = arith.addf %165, %160 : vector<1x128xf32>
    %167 = tpu.reciprocal %166 {approx = true} : vector<1x128xf32> -> vector<1x128xf32>
    %168 = arith.mulf %160, %167 : vector<1x128xf32>
    %cst_44 = arith.constant 9.99999993E-9 : f32
    %169 = vector.broadcast %cst_44 : f32 to vector<1x128xf32>
    %170 = arith.addf %160, %169 : vector<1x128xf32>
    %171 = math.rsqrt %170 : vector<1x128xf32>
    %172 = arith.mulf %168, %171 : vector<1x128xf32>
    %173 = vector.broadcast %172 : vector<1x128xf32> to vector<8x128xf32>
    %174 = arith.mulf %173, %164 : vector<8x128xf32>
    %175 = arith.addf %69, %174 : vector<8x128xf32>
    %176 = arith.mulf %121, %121 : vector<16x128xf32>
    %cst_45 = arith.constant dense<0.000000e+00> : vector<128xf32>
    %177 = vector.multi_reduction <add>, %176, %cst_45 [0] : vector<16x128xf32> to vector<128xf32>
    %178 = vector.shape_cast %177 : vector<128xf32> to vector<1x128xf32>
    %179 = vector.shape_cast %121 : vector<16x128xf32> to vector<1x16x128xf32>
    %180 = vector.broadcast %179 : vector<1x16x128xf32> to vector<8x16x128xf32>
    %181 = arith.mulf %6, %180 : vector<8x16x128xf32>
    %cst_46 = arith.constant dense<0.000000e+00> : vector<8x128xf32>
    %182 = vector.multi_reduction <add>, %181, %cst_46 [1] : vector<8x16x128xf32> to vector<8x128xf32>
    %cst_47 = arith.constant 1.000000e+00 : f32
    %183 = vector.broadcast %cst_47 : f32 to vector<1x128xf32>
    %184 = arith.addf %183, %178 : vector<1x128xf32>
    %185 = tpu.reciprocal %184 {approx = true} : vector<1x128xf32> -> vector<1x128xf32>
    %186 = arith.mulf %178, %185 : vector<1x128xf32>
    %cst_48 = arith.constant 9.99999993E-9 : f32
    %187 = vector.broadcast %cst_48 : f32 to vector<1x128xf32>
    %188 = arith.addf %178, %187 : vector<1x128xf32>
    %189 = math.rsqrt %188 : vector<1x128xf32>
    %190 = arith.mulf %186, %189 : vector<1x128xf32>
    %191 = vector.broadcast %190 : vector<1x128xf32> to vector<8x128xf32>
    %192 = arith.mulf %191, %182 : vector<8x128xf32>
    %193 = arith.addf %86, %192 : vector<8x128xf32>
    %194 = arith.maximumf %139, %157 : vector<8x128xf32>
    %195 = arith.maximumf %194, %175 : vector<8x128xf32>
    %196 = arith.maximumf %195, %193 : vector<8x128xf32>
    %197 = arith.subf %139, %196 : vector<8x128xf32>
    %198 = math.exp %197 : vector<8x128xf32>
    %199 = arith.subf %157, %196 : vector<8x128xf32>
    %200 = math.exp %199 : vector<8x128xf32>
    %201 = arith.subf %175, %196 : vector<8x128xf32>
    %202 = math.exp %201 : vector<8x128xf32>
    %203 = arith.subf %193, %196 : vector<8x128xf32>
    %204 = math.exp %203 : vector<8x128xf32>
    %205 = arith.addf %198, %200 : vector<8x128xf32>
    %206 = arith.addf %205, %202 : vector<8x128xf32>
    %207 = arith.addf %206, %204 : vector<8x128xf32>
    %208 = tpu.reciprocal %207 {approx = true} : vector<8x128xf32> -> vector<8x128xf32>
    %209 = arith.mulf %198, %208 : vector<8x128xf32>
    %210 = arith.mulf %200, %208 : vector<8x128xf32>
    %211 = arith.mulf %202, %208 : vector<8x128xf32>
    %212 = arith.mulf %204, %208 : vector<8x128xf32>
    %213 = vector.shape_cast %209 : vector<8x128xf32> to vector<8x1x128xf32>
    %214 = vector.broadcast %213 : vector<8x1x128xf32> to vector<8x16x128xf32>
    %215 = arith.mulf %214, %3 : vector<8x16x128xf32>
    %cst_49 = arith.constant dense<0.000000e+00> : vector<16x128xf32>
    %216 = vector.multi_reduction <add>, %215, %cst_49 [0] : vector<8x16x128xf32> to vector<16x128xf32>
    %217 = vector.shape_cast %210 : vector<8x128xf32> to vector<8x1x128xf32>
    %218 = vector.broadcast %217 : vector<8x1x128xf32> to vector<8x16x128xf32>
    %219 = arith.mulf %218, %4 : vector<8x16x128xf32>
    %cst_50 = arith.constant dense<0.000000e+00> : vector<16x128xf32>
    %220 = vector.multi_reduction <add>, %219, %cst_50 [0] : vector<8x16x128xf32> to vector<16x128xf32>
    %221 = vector.shape_cast %211 : vector<8x128xf32> to vector<8x1x128xf32>
    %222 = vector.broadcast %221 : vector<8x1x128xf32> to vector<8x16x128xf32>
    %223 = arith.mulf %222, %5 : vector<8x16x128xf32>
    %cst_51 = arith.constant dense<0.000000e+00> : vector<16x128xf32>
    %224 = vector.multi_reduction <add>, %223, %cst_51 [0] : vector<8x16x128xf32> to vector<16x128xf32>
    %225 = vector.shape_cast %212 : vector<8x128xf32> to vector<8x1x128xf32>
    %226 = vector.broadcast %225 : vector<8x1x128xf32> to vector<8x16x128xf32>
    %227 = arith.mulf %226, %6 : vector<8x16x128xf32>
    %cst_52 = arith.constant dense<0.000000e+00> : vector<16x128xf32>
    %228 = vector.multi_reduction <add>, %227, %cst_52 [0] : vector<8x16x128xf32> to vector<16x128xf32>
    %229 = arith.mulf %216, %216 : vector<16x128xf32>
    %cst_53 = arith.constant dense<0.000000e+00> : vector<128xf32>
    %230 = vector.multi_reduction <add>, %229, %cst_53 [0] : vector<16x128xf32> to vector<128xf32>
    %231 = vector.shape_cast %230 : vector<128xf32> to vector<1x128xf32>
    %232 = arith.mulf %220, %220 : vector<16x128xf32>
    %cst_54 = arith.constant dense<0.000000e+00> : vector<128xf32>
    %233 = vector.multi_reduction <add>, %232, %cst_54 [0] : vector<16x128xf32> to vector<128xf32>
    %234 = vector.shape_cast %233 : vector<128xf32> to vector<1x128xf32>
    %235 = arith.mulf %224, %224 : vector<16x128xf32>
    %cst_55 = arith.constant dense<0.000000e+00> : vector<128xf32>
    %236 = vector.multi_reduction <add>, %235, %cst_55 [0] : vector<16x128xf32> to vector<128xf32>
    %237 = vector.shape_cast %236 : vector<128xf32> to vector<1x128xf32>
    %238 = arith.mulf %228, %228 : vector<16x128xf32>
    %cst_56 = arith.constant dense<0.000000e+00> : vector<128xf32>
    %239 = vector.multi_reduction <add>, %238, %cst_56 [0] : vector<16x128xf32> to vector<128xf32>
    %240 = vector.shape_cast %239 : vector<128xf32> to vector<1x128xf32>
    %241 = tpu.concatenate %231, %234, %237, %240 in 0 : vector<1x128xf32>, vector<1x128xf32>, vector<1x128xf32>, vector<1x128xf32> -> vector<4x128xf32>
    %cst_57 = arith.constant 1.000000e+00 : f32
    %242 = vector.broadcast %cst_57 : f32 to vector<4x128xf32>
    %243 = arith.addf %242, %241 : vector<4x128xf32>
    %244 = tpu.reciprocal %243 {approx = true} : vector<4x128xf32> -> vector<4x128xf32>
    %245 = arith.mulf %241, %244 : vector<4x128xf32>
    %246 = math.sqrt %241 : vector<4x128xf32>
    %247 = arith.mulf %245, %246 : vector<4x128xf32>
    %cst_58 = arith.constant 9.99999993E-9 : f32
    %248 = vector.broadcast %cst_58 : f32 to vector<4x128xf32>
    %249 = arith.addf %241, %248 : vector<4x128xf32>
    %250 = math.rsqrt %249 : vector<4x128xf32>
    %251 = arith.mulf %247, %250 : vector<4x128xf32>
    %c0_59 = arith.constant 0 : index
    %c0_60 = arith.constant 0 : index
    %252 = vector.load %arg3[%c0_59, %c0_60] : memref<4x128xf32, #tpu.memory_space<vmem>>, vector<4x128xf32>
    tpu.vector_store %arg3[%c0_59, %c0_60], %251 {strides = array<i32>} : memref<4x128xf32, #tpu.memory_space<vmem>>, vector<4x128xf32>,
    return
  }
  func.func @transform_0(%arg0: i32) -> (i32, i32, i32) {
    %c0_i32 = arith.constant 0 : i32
    %c0_i32_0 = arith.constant 0 : i32
    %c0_i32_1 = arith.constant 0 : i32
    return %c0_i32, %c0_i32_0, %arg0 : i32, i32, i32
  }
  func.func @transform_1(%arg0: i32) -> (i32, i32, i32) {
    %c0_i32 = arith.constant 0 : i32
    %c0_i32_0 = arith.constant 0 : i32
    %c0_i32_1 = arith.constant 0 : i32
    %c0_i32_2 = arith.constant 0 : i32
    return %c0_i32, %c0_i32_0, %c0_i32_1 : i32, i32, i32
  }
  func.func @transform_2(%arg0: i32) -> (i32, i32) {
    %c0_i32 = arith.constant 0 : i32
    %c0_i32_0 = arith.constant 0 : i32
    return %c0_i32, %arg0 : i32, i32
  }
}

</mosaic_0001>

<bundles_post_ra>
// kernel: _capsule_network_impl.1
= control target key start
LH: loop header
LB: loop body
LE: loop exit
PB: predicated region body
PF: predicated region fallthrough
CT: control target
= control target key end

     0   :  { %vm140_vm0 = vcmask 261120   ;;  %vm861_vm1 = vcmask 1041409   ;;  %vm863_vm2 = vcmask 1042434   ;;  %vm865_vm3 = vcmask 1043459   ;;  %s3848_s0 = inlined_call_operand.vmem [shape: bf16[8,32,128], index: 0, kind: input, shape index: {}]   ;;  %s3849_s1 = inlined_call_operand.vmem [shape: bf16[8,64,32], index: 1, kind: input, shape index: {}]   ;;  %s3850_s2 = inlined_call_operand.vmem [shape: f32[4,128], index: 2, kind: output, shape index: {}]  }
   0x1   :  { %v2450_v0 = vld [vmem:[%s3848_s0 + $0x8] sm:$0xff]  ;;  %v2452_v1 = vld [vmem:[%s3848_s0 + $0x18] sm:$0xff]  ;;  %v2449_v4 = vld [vmem:[%s3848_s0] sm:$0xff]  ;;  %vm867_vm4 = vcmask 1044484   ;;  %vm869_vm5 = vcmask 1045509   ;;  %vm871_vm6 = vcmask 1046534  }
   0x2   :  { %v2454_v2 = vld [vmem:[%s3848_s0 + $0x28] sm:$0xff]  ;;  %v2456_v3 = vld [vmem:[%s3848_s0 + $0x38] sm:$0xff]  ;;  %159 = vmatpush.bf16.msra.mxu0 %v2450_v0  ;;  %232 = vmatpush.bf16.msra.mxu1 %v2452_v1  ;;  %v2451_v5 = vld [vmem:[%s3848_s0 + $0x10] sm:$0xff]  ;;  %vm873_vm13 = vcmask 1047559  }
   0x3   :  { %305 = vmatpush.bf16.msra.mxu2 %v2454_v2  ;;  %378 = vmatpush.bf16.msra.mxu3 %v2456_v3  ;;  %v2453_v6 = vld [vmem:[%s3848_s0 + $0x20] sm:$0xff]  ;;  %v2455_v7 = vld [vmem:[%s3848_s0 + $0x30] sm:$0xff]  ;;  %v2462_v8 = vld [vmem:[%s3848_s0 + $0x68] sm:$0xff] }
   0x4   :  { %v2458_v9 = vld [vmem:[%s3848_s0 + $0x48] sm:$0xff]  ;;  %v2465_v10 = vld [vmem:[%s3849_s1] sm:$0xff]  ;;  %v2464_v14 = vld [vmem:[%s3848_s0 + $0x78] sm:$0xff] }
   0x5   :  { %v2469_v11 = vld [vmem:[%s3849_s1 + $0x20] sm:$0xff]  ;;  %v2460_v15 = vld [vmem:[%s3848_s0 + $0x58] sm:$0xff]  ;;  %v2463_v18 = vld [vmem:[%s3848_s0 + $0x70] sm:$0xff] }
   0x6   :  { %160 = vmatpush.bf16.msra.mxu0 %v2449_v4  ;;  %233 = vmatpush.bf16.msra.mxu1 %v2451_v5  ;;  %v2473_v12 = vld [vmem:[%s3849_s1 + $0x40] sm:$0xff]  ;;  %v2459_v19 = vld [vmem:[%s3848_s0 + $0x50] sm:$0xff]  ;;  %v2466_v20 = vld [vmem:[%s3849_s1 + $0x8] sm:$0xff] }
   0x7   :  { %v2477_v13 = vld [vmem:[%s3849_s1 + $0x60] sm:$0xff]  ;;  %306 = vmatpush.bf16.msra.mxu2 %v2453_v6  ;;  %379 = vmatpush.bf16.msra.mxu3 %v2455_v7  ;;  %v2470_v21 = vld [vmem:[%s3849_s1 + $0x28] sm:$0xff]  ;;  %v2467_v24 = vld [vmem:[%s3849_s1 + $0x10] sm:$0xff] }
   0x8   :  { %v2461_v16 = vld [vmem:[%s3848_s0 + $0x60] sm:$0xff]  ;;  %v2474_v22 = vld [vmem:[%s3849_s1 + $0x48] sm:$0xff]  ;;  %v2471_v25 = vld [vmem:[%s3849_s1 + $0x30] sm:$0xff] }
   0x9   :  { %2249 = vmatmul.msk.bf16.vlgmr.msra.gmra.mxu0 %vm140_vm0, %v2465_v10  ;;  %2277 = vmatmul.msk.bf16.vlgmr.msra.gmra.mxu1 %vm140_vm0, %v2469_v11  ;;  %v2457_v17 = vld [vmem:[%s3848_s0 + $0x40] sm:$0xff]  ;;  %v2478_v23 = vld [vmem:[%s3849_s1 + $0x68] sm:$0xff]  ;;  %v2475_v26 = vld [vmem:[%s3849_s1 + $0x50] sm:$0xff] }
   0xa   :  { %451 = vmatpush.bf16.msrb.mxu0 %v2458_v9  ;;  %2305 = vmatmul.msk.bf16.vlgmr.msra.gmra.mxu2 %vm140_vm0, %v2473_v12  ;;  %v2479_v27 = vld [vmem:[%s3849_s1 + $0x70] sm:$0xff]  ;;  %v2468_v28 = vld [vmem:[%s3849_s1 + $0x18] sm:$0xff]  ;;  %v2481_v32 = vld [vmem:[%s3849_s1 + $0x80] sm:$0xff] }
   0xb   :  { %597 = vmatpush.bf16.msrb.mxu2 %v2462_v8  ;;  %2333 = vmatmul.msk.bf16.vlgmr.msra.gmra.mxu3 %vm140_vm0, %v2477_v13  ;;  %v2472_v29 = vld [vmem:[%s3849_s1 + $0x38] sm:$0xff]  ;;  %v2485_v33 = vld [vmem:[%s3849_s1 + $0xa0] sm:$0xff]  ;;  %v2482_v36 = vld [vmem:[%s3849_s1 + $0x88] sm:$0xff] }
   0xc   :  { %670 = vmatpush.bf16.msrb.mxu3 %v2464_v14  ;;  %524 = vmatpush.bf16.msrb.mxu1 %v2460_v15  ;;  %v2476_v30 = vld [vmem:[%s3849_s1 + $0x58] sm:$0xff]  ;;  %v2489_v34 = vld [vmem:[%s3849_s1 + $0xc0] sm:$0xff]  ;;  %v2486_v37 = vld [vmem:[%s3849_s1 + $0xa8] sm:$0xff] }
   0xd   :  { %v2480_v31 = vld [vmem:[%s3849_s1 + $0x78] sm:$0xff]  ;;  %v2493_v35 = vld [vmem:[%s3849_s1 + $0xe0] sm:$0xff]  ;;  %v2490_v38 = vld [vmem:[%s3849_s1 + $0xc8] sm:$0xff] }
   0xe   :  { %452 = vmatpush.bf16.msrb.mxu0 %v2457_v17  ;;  %v2494_v39 = vld [vmem:[%s3849_s1 + $0xe8] sm:$0xff]  ;;  %v2483_v40 = vld [vmem:[%s3849_s1 + $0x90] sm:$0xff]  ;;  %v2484_v44 = vld [vmem:[%s3849_s1 + $0x98] sm:$0xff] }
   0xf   :  { %598 = vmatpush.bf16.msrb.mxu2 %v2461_v16  ;;  %v2487_v41 = vld [vmem:[%s3849_s1 + $0xb0] sm:$0xff]  ;;  %v2488_v45 = vld [vmem:[%s3849_s1 + $0xb8] sm:$0xff] }
  0x10   :  { %671 = vmatpush.bf16.msrb.mxu3 %v2463_v18  ;;  %525 = vmatpush.bf16.msrb.mxu1 %v2459_v19  ;;  %v2491_v42 = vld [vmem:[%s3849_s1 + $0xd0] sm:$0xff]  ;;  %v2492_v46 = vld [vmem:[%s3849_s1 + $0xd8] sm:$0xff] }
  0x11   :  { %v2495_v43 = vld [vmem:[%s3849_s1 + $0xf0] sm:$0xff]  ;;  %v2496_v47 = vld [vmem:[%s3849_s1 + $0xf8] sm:$0xff] }
  0x19   :  { %2250 = vmatmul.msk.bf16.gmra.mxu0 %vm140_vm0, %v2466_v20  ;;  %2278 = vmatmul.msk.bf16.gmra.mxu1 %vm140_vm0, %v2470_v21 }
  0x1a   :  { %2306 = vmatmul.msk.bf16.gmra.mxu2 %vm140_vm0, %v2474_v22 }
  0x1b   :  { %2334 = vmatmul.msk.bf16.gmra.mxu3 %vm140_vm0, %v2478_v23 }
  0x29   :  { %2251 = vmatmul.msk.bf16.gmra.mxu0 %vm140_vm0, %v2467_v24  ;;  %2279 = vmatmul.msk.bf16.gmra.mxu1 %vm140_vm0, %v2471_v25 }
  0x2a   :  { %2307 = vmatmul.msk.bf16.gmra.mxu2 %vm140_vm0, %v2475_v26 }
  0x2b   :  { %2335 = vmatmul.msk.bf16.gmra.mxu3 %vm140_vm0, %v2479_v27 }
  0x39   :  { %2252 = vmatmul.msk.bf16.gmra.mxu0 %vm140_vm0, %v2468_v28  ;;  %2280 = vmatmul.msk.bf16.gmra.mxu1 %vm140_vm0, %v2472_v29 }
  0x3a   :  { %2308 = vmatmul.msk.bf16.gmra.mxu2 %vm140_vm0, %v2476_v30 }
  0x3b   :  { %2336 = vmatmul.msk.bf16.gmra.mxu3 %vm140_vm0, %v2480_v31 }
  0x49   :  { %2361 = vmatmul.msk.bf16.vlgmr.msrb.gmra.mxu0 %vm140_vm0, %v2481_v32  ;;  %2389 = vmatmul.msk.bf16.vlgmr.msrb.gmra.mxu1 %vm140_vm0, %v2485_v33 }
  0x4a   :  { %2417 = vmatmul.msk.bf16.vlgmr.msrb.gmra.mxu2 %vm140_vm0, %v2489_v34 }
  0x4b   :  { %2445 = vmatmul.msk.bf16.vlgmr.msrb.gmra.mxu3 %vm140_vm0, %v2493_v35 }
  0x59   :  { %2362 = vmatmul.msk.bf16.gmra.mxu0 %vm140_vm0, %v2482_v36  ;;  %2390 = vmatmul.msk.bf16.gmra.mxu1 %vm140_vm0, %v2486_v37 }
  0x5a   :  { %2418 = vmatmul.msk.bf16.gmra.mxu2 %vm140_vm0, %v2490_v38 }
  0x5b   :  { %2446 = vmatmul.msk.bf16.gmra.mxu3 %vm140_vm0, %v2494_v39 }
  0x69   :  { %2363 = vmatmul.msk.bf16.gmra.mxu0 %vm140_vm0, %v2483_v40  ;;  %2391 = vmatmul.msk.bf16.gmra.mxu1 %vm140_vm0, %v2487_v41 }
  0x6a   :  { %2419 = vmatmul.msk.bf16.gmra.mxu2 %vm140_vm0, %v2491_v42 }
  0x6b   :  { %2447 = vmatmul.msk.bf16.gmra.mxu3 %vm140_vm0, %v2495_v43 }
  0x79   :  { %2364 = vmatmul.msk.bf16.gmra.mxu0 %vm140_vm0, %v2484_v44  ;;  %2392 = vmatmul.msk.bf16.gmra.mxu1 %vm140_vm0, %v2488_v45 }
  0x7a   :  { %2420 = vmatmul.msk.bf16.gmra.mxu2 %vm140_vm0, %v2492_v46 }
  0x7b   :  { %2448 = vmatmul.msk.bf16.gmra.mxu3 %vm140_vm0, %v2496_v47 }
  0x86   :  { %v2746_v48 = vpop.f32.mrf.mxu0  ;;  %v2748_v49 = vpop.f32.mrf.mxu1 }
  0x87   :  { %4003 = vst [vmem:[#allocation2_spill] sm:$0xff] %v2746_v48  ;;  %v693_v14 = vadd.f32 %v2748_v49, %v2746_v48 }
  0x88   :  { %4004 = vst [vmem:[#allocation3_spill] sm:$0xff] %v2748_v49 }
  0x8d   :  { %v2750_v50 = vpop.f32.mrf.mxu2 }
  0x8e   :  { %4005 = vst [vmem:[#allocation4_spill] sm:$0xff] %v2750_v50  ;;  %v2752_v51 = vpop.f32.mrf.mxu3  ;;  %v2754_v52 = vpop.f32.mrf.mxu0  ;;  %v694_v17 = vadd.f32 %v693_v14, %v2750_v50 }
  0x8f   :  { %4006 = vst [vmem:[#allocation5_spill] sm:$0xff] %v2752_v51  ;;  %v2756_v53 = vpop.f32.mrf.mxu1 }
  0x90   :  { %4007 = vst [vmem:[#allocation6_spill] sm:$0xff] %v2754_v52  ;;  %v700_v19 = vadd.f32 %v2756_v53, %v2754_v52  ;;  %v695_v21 = vadd.f32 %v694_v17, %v2752_v51 }
  0x91   :  { %4008 = vst [vmem:[#allocation7_spill] sm:$0xff] %v2756_v53 }
  0x95   :  { %v2758_v54 = vpop.f32.mrf.mxu2 }
  0x96   :  { %4009 = vst [vmem:[#allocation8_spill] sm:$0xff] %v2758_v54  ;;  %v2760_v55 = vpop.f32.mrf.mxu3  ;;  %v2762_v56 = vpop.f32.mrf.mxu0  ;;  %v701_v22 = vadd.f32 %v700_v19, %v2758_v54 }
  0x97   :  { %4010 = vst [vmem:[#allocation9_spill] sm:$0xff] %v2760_v55  ;;  %v2764_v57 = vpop.f32.mrf.mxu1 }
  0x98   :  { %4011 = vst [vmem:[#allocation10_spill] sm:$0xff] %v2762_v56  ;;  %v702_v26 = vadd.f32 %v701_v22, %v2760_v55  ;;  %v709_v14 = vadd.f32 %v2764_v57, %v2762_v56 }
  0x99   :  { %4012 = vst [vmem:[#allocation11_spill] sm:$0xff] %v2764_v57 }
  0x9d   :  { %v2766_v58 = vpop.f32.mrf.mxu2 }
  0x9e   :  { %4013 = vst [vmem:[#allocation12_spill] sm:$0xff] %v2766_v58  ;;  %v2768_v59 = vpop.f32.mrf.mxu3  ;;  %v2770_v60 = vpop.f32.mrf.mxu0  ;;  %v710_v22 = vadd.f32 %v709_v14, %v2766_v58 }
  0x9f   :  { %4014 = vst [vmem:[#allocation13_spill] sm:$0xff] %v2768_v59  ;;  %v2772_v61 = vpop.f32.mrf.mxu1 }
  0xa0   :  { %4015 = vst [vmem:[#allocation14_spill] sm:$0xff] %v2770_v60 }
  0xa1   :  { %4016 = vst [vmem:[#allocation15_spill] sm:$0xff] %v2772_v61 }
  0xa5   :  { %v2774_v62 = vpop.f32.mrf.mxu2 }
  0xa6   :  { %4017 = vst [vmem:[#allocation16_spill] sm:$0xff] %v2774_v62  ;;  %v2776_v63 = vpop.f32.mrf.mxu3  ;;  %v2778_v0 = vpop.f32.mrf.mxu0 }
  0xa7   :  { %4018 = vst [vmem:[#allocation17_spill] sm:$0xff] %v2776_v63  ;;  %v2780_v1 = vpop.f32.mrf.mxu1 }
  0xa8   :  { %4019 = vst [vmem:[#allocation18_spill] sm:$0xff] %v2778_v0 }
  0xa9   :  { %4020 = vst [vmem:[#allocation19_spill] sm:$0xff] %v2780_v1 }
  0xad   :  { %v2782_v2 = vpop.f32.mrf.mxu2 }
  0xae   :  { %4021 = vst [vmem:[#allocation20_spill] sm:$0xff] %v2782_v2  ;;  %v2784_v3 = vpop.f32.mrf.mxu3  ;;  %v2786_v4 = vpop.f32.mrf.mxu0 }
  0xaf   :  { %4022 = vst [vmem:[#allocation21_spill] sm:$0xff] %v2784_v3  ;;  %v2788_v5 = vpop.f32.mrf.mxu1 }
  0xb0   :  { %4023 = vst [vmem:[#allocation22_spill] sm:$0xff] %v2786_v4 }
  0xb1   :  { %4024 = vst [vmem:[#allocation23_spill] sm:$0xff] %v2788_v5 }
  0xb5   :  { %v2790_v6 = vpop.f32.mrf.mxu2 }
  0xb6   :  { %4025 = vst [vmem:[#allocation24_spill] sm:$0xff] %v2790_v6  ;;  %v2792_v7 = vpop.f32.mrf.mxu3  ;;  %v2794_v8 = vpop.f32.mrf.mxu0 }
  0xb7   :  { %4026 = vst [vmem:[#allocation25_spill] sm:$0xff] %v2792_v7  ;;  %v2796_v9 = vpop.f32.mrf.mxu1 }
  0xb8   :  { %4027 = vst [vmem:[#allocation26_spill] sm:$0xff] %v2794_v8 }
  0xb9   :  { %4028 = vst [vmem:[#allocation27_spill] sm:$0xff] %v2796_v9 }
  0xbd   :  { %v2798_v10 = vpop.f32.mrf.mxu2 }
  0xbe   :  { %4029 = vst [vmem:[#allocation28_spill] sm:$0xff] %v2798_v10  ;;  %v2800_v11 = vpop.f32.mrf.mxu3  ;;  %v2802_v12 = vpop.f32.mrf.mxu0 }
  0xbf   :  { %4030 = vst [vmem:[#allocation29_spill] sm:$0xff] %v2800_v11  ;;  %v2804_v13 = vpop.f32.mrf.mxu1 }
  0xc0   :  { %4031 = vst [vmem:[#allocation30_spill] sm:$0xff] %v2802_v12 }
  0xc1   :  { %4032 = vst [vmem:[#allocation31_spill] sm:$0xff] %v2804_v13 }
  0xc5   :  { %v2808_v15 = vpop.f32.mrf.mxu2 }
  0xc6   :  { %4033 = vst [vmem:[#allocation32_spill] sm:$0xff] %v2808_v15  ;;  %v2810_v16 = vpop.f32.mrf.mxu3  ;;  %v2813_v18 = vpop.f32.mrf.mxu0 }
  0xc7   :  { %4034 = vst [vmem:[#allocation33_spill] sm:$0xff] %v2810_v16  ;;  %v2817_v20 = vpop.f32.mrf.mxu1  ;;  %v696_v23 = vadd.f32 %v695_v21, %v2813_v18 }
  0xc8   :  { %4035 = vst [vmem:[#allocation34_spill] sm:$0xff] %v2813_v18 }
  0xc9   :  { %4036 = vst [vmem:[#allocation35_spill] sm:$0xff] %v2817_v20  ;;  %v697_v28 = vadd.f32 %v696_v23, %v2817_v20 }
  0xcd   :  { %v2822_v24 = vpop.f32.mrf.mxu2 }
  0xce   :  { %4037 = vst [vmem:[#allocation36_spill] sm:$0xff] %v2822_v24  ;;  %v2824_v25 = vpop.f32.mrf.mxu3  ;;  %v2827_v27 = vpop.f32.mrf.mxu0  ;;  %v698_v30 = vadd.f32 %v697_v28, %v2822_v24 }
  0xcf   :  { %4038 = vst [vmem:[#allocation37_spill] sm:$0xff] %v2824_v25  ;;  %v703_v29 = vadd.f32 %v702_v26, %v2827_v27  ;;  %v2832_v31 = vpop.f32.mrf.mxu1 }
  0xd0   :  { %4039 = vst [vmem:[#allocation38_spill] sm:$0xff] %v2827_v27  ;;  %v699_v34 = vadd.f32 %v698_v30, %v2824_v25 }
  0xd1   :  { %4040 = vst [vmem:[#allocation39_spill] sm:$0xff] %v2832_v31  ;;  %v704_v32 = vadd.f32 %v703_v29, %v2832_v31 }
  0xd2   :  { %v2842_v38 = vmul.f32 0.25, %v699_v34 }
  0xd4   :  { %v757_v43 = vmul.f32 %v2842_v38, %v2842_v38  ;;  %v766_v44 = vmul.f32 %v2842_v38, %v2746_v48  ;;  %v768_v45 = vmul.f32 %v2842_v38, %v2748_v49  ;;  %v770_v21 = vmul.f32 %v2842_v38, %v2750_v50 }
  0xd5   :  { %v2835_v33 = vpop.f32.mrf.mxu2  ;;  %v772_v30 = vmul.f32 %v2842_v38, %v2752_v51  ;;  %v776_v14 = vmul.f32 %v2842_v38, %v2817_v20 }
  0xd6   :  { %4041 = vst [vmem:[#allocation40_spill] sm:$0xff] %v2835_v33  ;;  %v705_v35 = vadd.f32 %v704_v32, %v2835_v33  ;;  %v2839_v36 = vpop.f32.mrf.mxu3  ;;  %v2867_v26 = vpop.f32.mrf.mxu0 }
  0xd7   :  { %4042 = vst [vmem:[#allocation41_spill] sm:$0xff] %v2839_v36 }
  0xd8   :  { %v706_v37 = vadd.f32 %v705_v35, %v2839_v36  ;;  %4043 = vst [vmem:[#allocation42_spill] sm:$0xff] %v2867_v26 }
  0xda   :  { %v2844_v39 = vmul.f32 0.25, %v706_v37  ;;  %v711_v37 = vadd.f32 %v710_v22, %v2768_v59 }
  0xdc   :  { %v758_v40 = vmul.f32 %v2844_v39, %v2844_v39  ;;  %v767_v41 = vmul.f32 %v2844_v39, %v2754_v52  ;;  %v769_v42 = vmul.f32 %v2844_v39, %v2756_v53  ;;  %v771_v47 = vmul.f32 %v2844_v39, %v2758_v54 }
  0xdd   :  { %v773_v23 = vmul.f32 %v2844_v39, %v2760_v55  ;;  %v775_v35 = vmul.f32 %v2844_v39, %v2827_v27  ;;  %v779_v22 = vmul.f32 %v2844_v39, %v2835_v33 }
  0xde   :  { %v759_v46 = vadd.f32 %v758_v40, %v757_v43  ;;  %v782_v17 = vadd.f32 %v767_v41, %v766_v44  ;;  %v789_v19 = vadd.f32 %v769_v42, %v768_v45  ;;  %v796_v29 = vadd.f32 %v771_v47, %v770_v21  ;;  %v2878_v43 = vpop.f32.mrf.mxu1  ;;  %v2880_v44 = vpop.f32.mrf.mxu2 }
  0xdf   :  { %v716_v40 = vadd.f32 %v2772_v61, %v2770_v60  ;;  %v777_v41 = vmul.f32 %v2844_v39, %v2832_v31  ;;  %v803_v42 = vadd.f32 %v773_v23, %v772_v30  ;;  %4044 = vst [vmem:[#allocation43_spill] sm:$0xff] %v2878_v43  ;;  %v774_v47 = vmul.f32 %v2842_v38, %v2813_v18  ;;  %v2892_v18 = vpop.f32.mrf.mxu3 }
  0xe0   :  { %v760_v28 = vrot.slane %v759_v46, 4  ;;  %v783_v32 = vrot.slane %v782_v17, 4  ;;  %v790_v34 = vrot.slane %v789_v19, 4  ;;  %4045 = vst [vmem:[#allocation44_spill] sm:$0xff] %v2880_v44  ;;  %v797_v21 = vrot.slane %v796_v29, 4 }
  0xe1   :  { %v712_v31 = vadd.f32 %v711_v37, %v2867_v26  ;;  %v717_v23 = vadd.f32 %v716_v40, %v2774_v62  ;;  %v810_v30 = vadd.f32 %v775_v35, %v774_v47  ;;  %v817_v51 = vadd.f32 %v777_v41, %v776_v14  ;;  %4046 = vst [vmem:[#allocation45_spill] sm:$0xff] %v2892_v18 }
  0xe2   :  { %v761_v45 = vadd.f32 %v760_v28, %v759_v46  ;;  %v784_v27 = vadd.f32 %v783_v32, %v782_v17  ;;  %v791_v55 = vadd.f32 %v790_v34, %v789_v19  ;;  %v778_v46 = vmul.f32 %v2842_v38, %v2822_v24  ;;  %v2895_v19 = vpop.f32.mrf.mxu0 }
  0xe3   :  { %v804_v28 = vrot.slane %v803_v42, 4  ;;  %v798_v20 = vadd.f32 %v797_v21, %v796_v29  ;;  %v713_v17 = vadd.f32 %v712_v31, %v2878_v43  ;;  %4047 = vst [vmem:[#allocation46_spill] sm:$0xff] %v2895_v19  ;;  %v718_v32 = vadd.f32 %v717_v23, %v2776_v63 }
  0xe4   :  { %v762_v54 = vrot.slane %v761_v45, 2  ;;  %v785_v50 = vrot.slane %v784_v27, 2  ;;  %v792_v52 = vrot.slane %v791_v55, 2  ;;  %v824_v53 = vadd.f32 %v779_v22, %v778_v46 }
  0xe5   :  { %v725_v34 = vadd.f32 %v2780_v1, %v2778_v0  ;;  %v811_v35 = vrot.slane %v810_v30, 4  ;;  %v805_v37 = vadd.f32 %v804_v28, %v803_v42  ;;  %v818_v40 = vrot.slane %v817_v51, 4 }
  0xe6   :  { %v714_v41 = vadd.f32 %v713_v17, %v2880_v44  ;;  %v763_v29 = vadd.f32 %v762_v54, %v761_v45  ;;  %v799_v14 = vrot.slane %v798_v20, 2  ;;  %v719_v21 = vadd.f32 %v718_v32, %v2895_v19  ;;  %v2905_v33 = vpop.f32.mrf.mxu1  ;;  %v2907_v24 = vpop.f32.mrf.mxu2 }
  0xe7   :  { %v726_v47 = vadd.f32 %v725_v34, %v2782_v2  ;;  %v732_v31 = vadd.f32 %v2788_v5, %v2786_v4  ;;  %v786_v22 = vadd.f32 %v785_v50, %v784_v27  ;;  %v793_v46 = vadd.f32 %v792_v52, %v791_v55  ;;  %4048 = vst [vmem:[#allocation47_spill] sm:$0xff] %v2905_v33 }
  0xe8   :  { %v825_v23 = vrot.slane %v824_v53, 4  ;;  %4049 = vst [vmem:[#allocation48_spill] sm:$0xff] %v2907_v24  ;;  %v812_v42 = vadd.f32 %v811_v35, %v810_v30  ;;  %v715_v28 = vadd.f32 %v714_v41, %v2892_v18  ;;  %v720_v17 = vadd.f32 %v719_v21, %v2905_v33  ;;  %v2916_v35 = vpop.f32.mrf.mxu3 }
  0xe9   :  { %v733_v54 = vadd.f32 %v732_v31, %v2790_v6  ;;  %v806_v45 = vrot.slane %v805_v37, 2  ;;  %v819_v34 = vadd.f32 %v818_v40, %v817_v51  ;;  %v727_v32 = vadd.f32 %v726_v47, %v2784_v3  ;;  %4050 = vst [vmem:[#allocation49_spill] sm:$0xff] %v2916_v35 }
  0xea   :  { %v764_v48 = vrot.slane %v763_v29, 1  ;;  %v800_v49 = vadd.f32 %v799_v14, %v798_v20  ;;  %v721_v50 = vadd.f32 %v720_v17, %v2907_v24  ;;  %v741_v52 = vadd.f32 %v2796_v9, %v2794_v8  ;;  %v2927_v17 = vpop.f32.mrf.mxu0 }
  0xeb   :  { %v787_v55 = vrot.slane %v786_v22, 1  ;;  %v794_v27 = vrot.slane %v793_v46, 1  ;;  %v826_v30 = vadd.f32 %v825_v23, %v824_v53  ;;  %v748_v41 = vadd.f32 %v2804_v13, %v2802_v12  ;;  %4051 = vst [vmem:[#allocation50_spill] sm:$0xff] %v2927_v17 }
  0xec   :  { %v813_v21 = vrot.slane %v812_v42, 2  ;;  %v2920_v31 = vmul.f32 0.25, %v715_v28  ;;  %v722_v51 = vadd.f32 %v721_v50, %v2916_v35  ;;  %v734_v20 = vadd.f32 %v733_v54, %v2792_v7 }
  0xed   :  { %v2925_v40 = vadd.f32 %v741_v52, %v2798_v10  ;;  %v807_v47 = vadd.f32 %v806_v45, %v805_v37  ;;  %v820_v14 = vrot.slane %v819_v34, 2  ;;  %v2930_v53 = vadd.f32 %v748_v41, %v2808_v15 }
  0xee   :  { %v2932_v23 = vadd.f32 %v764_v48, %v763_v29  ;;  %v801_v9 = vrot.slane %v800_v49, 1  ;;  %v2934_v8 = vmul.f32 0.25, %v722_v51  ;;  %v788_v28 = vadd.f32 %v787_v55, %v786_v22 }
  0xef   :  { %v795_v13 = vadd.f32 %v794_v27, %v793_v46  ;;  %v827_v50 = vrot.slane %v826_v30, 2  ;;  %v781_v54 = vmul.f32 %v2844_v39, %v2839_v36  ;;  %v814_v52 = vadd.f32 %v813_v21, %v812_v42 }
  0xf0   :  { %v877_v37 = vmul.f32 %v2920_v31, %v2920_v31  ;;  %v878_v45 = vmul.f32 %v2934_v8, %v2934_v8  ;;  %v780_v48 = vmul.f32 %v2842_v38, %v2824_v25  ;;  %v808_v29 = vrot.slane %v807_v47, 1 }
  0xf1   :  { %v821_v41 = vadd.f32 %v820_v14, %v819_v34  ;;  %v802_v22 = vadd.f32 %v801_v9, %v800_v49  ;;  %v2945_v46 = vadd.f32 1e-08, %v2932_v23  ;;  %v887_v39 = vmul.f32 %v2934_v8, %v2770_v60  ;;  %v2956_v9 = vpop.f32.mrf.mxu1  ;;  %v2958_v14 = vpop.f32.mrf.mxu2 }
  0xf2   :  { %v879_v55 = vadd.f32 %v878_v45, %v877_v37  ;;  %v2949_v42 = vadd.f32 %v827_v50, %v826_v30  ;;  %v862_v27 = vsel %vm861_vm1, %v795_v13, %v788_v28  ;;  %v889_v21 = vmul.f32 %v2934_v8, %v2772_v61  ;;  %4052 = vst [vmem:[#allocation51_spill] sm:$0xff] %v2956_v9  ;;  %v2971_v25 = vpop.f32.mrf.mxu0 }
  0xf3   :  { %v815_v38 = vrot.slane %v814_v52, 1  ;;  %v831_v51 = vadd.f32 %v781_v54, %v780_v48  ;;  %v886_v49 = vmul.f32 %v2920_v31, %v2762_v56  ;;  %4053 = vst [vmem:[#allocation52_spill] sm:$0xff] %v2958_v14  ;;  %v809_v37 = vadd.f32 %v808_v29, %v807_v47 }
  0xf4   :  { %v880_v34 = vrot.slane %v879_v55, 4  ;;  %v822_v45 = vrot.slane %v821_v41, 1  ;;  %v888_v30 = vmul.f32 %v2920_v31, %v2764_v57  ;;  %v891_v13 = vmul.f32 %v2934_v8, %v2774_v62  ;;  %4054 = vst [vmem:[#allocation53_spill] sm:$0xff] %v2971_v25 }
  0xf5   :  { %2497 = vrsqrt.f32 %v2945_v46  ;;  %v864_v28 = vsel %vm863_vm2, %v802_v22, %v862_v27  ;;  %v902_v54 = vadd.f32 %v887_v39, %v886_v49  ;;  %v890_v48 = vmul.f32 %v2920_v31, %v2766_v58 }
  0xf6   :  { %v881_v50 = vadd.f32 %v880_v34, %v879_v55  ;;  %v893_v36 = vmul.f32 %v2934_v8, %v2776_v63  ;;  %v909_v47 = vadd.f32 %v889_v21, %v888_v30  ;;  %v728_v29 = vadd.f32 %v727_v32, %v2927_v17  ;;  %v2979_v32 = vpop.f32.mrf.mxu3 }
  0xf7   :  { %v816_v60 = vadd.f32 %v815_v38, %v814_v52  ;;  %v832_v56 = vrot.slane %v831_v51, 4  ;;  %v838_v62 = vadd.f32 1.0, %v2932_v23  ;;  %v892_v22 = vmul.f32 %v2920_v31, %v2768_v59  ;;  %4055 = vst [vmem:[#allocation54_spill] sm:$0xff] %v2979_v32 }
  0xf8   :  { %v882_v61 = vrot.slane %v881_v50, 2  ;;  %v916_v55 = vadd.f32 %v891_v13, %v890_v48  ;;  %v866_v39 = vsel %vm865_vm3, %v809_v37, %v864_v28  ;;  %v895_v27 = vmul.f32 %v2934_v8, %v2895_v19 }
  0xf9   :  { %v903_v21 = vrot.slane %v902_v54, 4  ;;  %v735_v52 = vadd.f32 %v734_v20, %v2971_v25  ;;  %v897_v38 = vmul.f32 %v2934_v8, %v2905_v33  ;;  %v910_v34 = vrot.slane %v909_v47, 4  ;;  %v2994_v58 = vpop.f32.mrf.mxu1 }
  0xfa   :  { %v923_v49 = vadd.f32 %v893_v36, %v892_v22  ;;  %v729_v30 = vadd.f32 %v728_v29, %v2956_v9  ;;  %v833_v13 = vadd.f32 %v832_v56, %v831_v51  ;;  %2499 = vrcp.f32 %v838_v62  ;;  %4056 = vst [vmem:[#allocation55_spill] sm:$0xff] %v2994_v58  ;;  %v2996_v56 = vpop.f32.mrf.mxu2 }
  0xfb   :  { %v2985_v63 = vpop.eup %2497  ;;  %v883_v37 = vadd.f32 %v882_v61, %v881_v50  ;;  %v894_v28 = vmul.f32 %v2920_v31, %v2867_v26  ;;  %v868_v48 = vsel %vm867_vm4, %v816_v60, %v866_v39  ;;  %v896_v20 = vmul.f32 %v2920_v31, %v2878_v43  ;;  %4057 = vst [vmem:[#allocation56_spill] sm:$0xff] %v2996_v56 }
  0xfc   :  { %v917_v19 = vrot.slane %v916_v55, 4  ;;  %v730_v33 = vadd.f32 %v729_v30, %v2958_v14  ;;  %v823_v59 = vadd.f32 %v822_v45, %v821_v41  ;;  %v829_v36 = vrot.slane %v2949_v42, 1 }
  0xfd   :  { %v904_v29 = vadd.f32 %v903_v21, %v902_v54  ;;  %v930_v22 = vadd.f32 %v895_v27, %v894_v28  ;;  %v911_v61 = vadd.f32 %v910_v34, %v909_v47  ;;  %v924_v62 = vrot.slane %v923_v49, 4 }
  0xfe   :  { %v937_v51 = vadd.f32 %v897_v38, %v896_v20  ;;  %v736_v60 = vadd.f32 %v735_v52, %v2994_v58  ;;  %v843_v50 = vmul.f32 %v2985_v63, %v2945_v46  ;;  %v870_v39 = vsel %vm869_vm5, %v823_v59, %v868_v48 }
  0xff   :  { %v884_v41 = vrot.slane %v883_v37, 1  ;;  %v834_v45 = vrot.slane %v833_v13, 2  ;;  %v918_v30 = vadd.f32 %v917_v19, %v916_v55  ;;  %v731_v54 = vadd.f32 %v730_v33, %v2979_v32 }
 0x100   :  { %v737_v27 = vadd.f32 %v736_v60, %v2996_v56  ;;  %v2500_v21 = vpop.eup %2499  ;;  %v3006_v47 = vadd.f32 %v2925_v40, %v2800_v11  ;;  %v830_v52 = vadd.f32 %v829_v36, %v2949_v42  ;;  %v905_v38 = vrot.slane %v904_v29, 2  ;;  %v3021_v42 = vpop.f32.mrf.mxu3 }
 0x101   :  { %v931_v34 = vrot.slane %v930_v22, 4  ;;  %v912_v28 = vrot.slane %v911_v61, 2  ;;  %v925_v20 = vadd.f32 %v924_v62, %v923_v49  ;;  %v938_v59 = vrot.slane %v937_v51, 4  ;;  %4058 = vst [vmem:[#allocation57_spill] sm:$0xff] %v3021_v42 }
 0x102   :  { %v3011_v48 = vadd.f32 %v2930_v53, %v2810_v16  ;;  %v844_v33 = vmul.f32 %v2985_v63, %v843_v50  ;;  %v3015_v19 = vsel %vm871_vm6, %v830_v52, %v870_v39  ;;  %v3017_v55 = vadd.f32 %v884_v41, %v883_v37 }
 0x103   :  { %v899_v40 = vmul.f32 %v2934_v8, %v2907_v24  ;;  %v3023_v36 = vadd.f32 %v834_v45, %v833_v13  ;;  %v919_v49 = vrot.slane %v918_v30, 2  ;;  %v3025_v62 = vmul.f32 0.25, %v731_v54 }
 0x104   :  { %v738_v53 = vadd.f32 %v737_v27, %v3021_v42  ;;  %v3029_v60 = vmul.f32 %v2500_v21, %v2932_v23  ;;  %v898_v50 = vmul.f32 %v2920_v31, %v2880_v44  ;;  %v906_v37 = vadd.f32 %v905_v38, %v904_v29 }
 0x105   :  { %v932_v39 = vadd.f32 %v931_v34, %v930_v22  ;;  %v913_v41 = vadd.f32 %v912_v28, %v911_v61  ;;  %v926_v52 = vrot.slane %v925_v20, 2  ;;  %v939_v24 = vadd.f32 %v938_v59, %v937_v51 }
 0x106   :  { %v3033_v43 = vmul.f32 0.25, %v738_v53  ;;  %v3035_v13 = vmul.f32 0.5, %v844_v33  ;;  %v900_v45 = vmul.f32 %v2920_v31, %v2892_v18  ;;  %v944_v54 = vadd.f32 %v899_v40, %v898_v50 }
 0x107   :  { %v3040_v27 = vadd.f32 1e-08, %v3017_v55  ;;  %v901_v23 = vmul.f32 %v2934_v8, %v2916_v35  ;;  %v920_v21 = vadd.f32 %v919_v49, %v918_v30  ;;  %v990_v29 = vmul.f32 %v3025_v62, %v3025_v62 }
 0x108   :  { %v991_v22 = vmul.f32 %v3033_v43, %v3033_v43  ;;  %v907_v61 = vrot.slane %v906_v37, 1  ;;  %v933_v51 = vrot.slane %v932_v39, 2  ;;  %v1000_v38 = vmul.f32 %v3033_v43, %v2786_v4 }
 0x109   :  { %v1002_v31 = vmul.f32 %v3033_v43, %v2788_v5  ;;  %v914_v34 = vrot.slane %v913_v41, 1  ;;  %v927_v28 = vadd.f32 %v926_v52, %v925_v20  ;;  %v940_v59 = vrot.slane %v939_v24, 2 }
 0x10a   :  { %v992_v33 = vadd.f32 %v991_v22, %v990_v29  ;;  %v945_v8 = vrot.slane %v944_v54, 4  ;;  %2501 = vrsqrt.f32 %v3040_v27  ;;  %v999_v30 = vmul.f32 %v3025_v62, %v2778_v0 }
 0x10b   :  { %v1001_v40 = vmul.f32 %v3025_v62, %v2780_v1  ;;  %v921_v49 = vrot.slane %v920_v21, 1  ;;  %v1004_v50 = vmul.f32 %v3033_v43, %v2790_v6  ;;  %v1006_v4 = vmul.f32 %v3033_v43, %v2792_v7  ;;  %v3067_v1 = vpop.f32.mrf.mxu0 }
 0x10c   :  { %v993_v53 = vrot.slane %v992_v33, 4  ;;  %v908_v20 = vadd.f32 %v907_v61, %v906_v37  ;;  %v1008_v52 = vmul.f32 %v3033_v43, %v2971_v25  ;;  %v1015_v29 = vadd.f32 %v1000_v38, %v999_v30  ;;  %4059 = vst [vmem:[#allocation58_spill] sm:$0xff] %v3067_v1 }
 0x10d   :  { %v1022_v22 = vadd.f32 %v1002_v31, %v1001_v40  ;;  %v915_v5 = vadd.f32 %v914_v34, %v913_v41  ;;  %v1003_v18 = vmul.f32 %v3025_v62, %v2782_v2  ;;  %v1005_v0 = vmul.f32 %v3025_v62, %v2784_v3 }
 0x10e   :  { %v994_v35 = vadd.f32 %v993_v53, %v992_v33  ;;  %v934_v6 = vadd.f32 %v933_v51, %v932_v39  ;;  %v946_v44 = vadd.f32 %v945_v8, %v944_v54  ;;  %v951_v26 = vadd.f32 %v901_v23, %v900_v45 }
 0x10f   :  { %v1007_v37 = vmul.f32 %v3025_v62, %v2927_v17  ;;  %v928_v38 = vrot.slane %v927_v28, 1  ;;  %v1029_v31 = vadd.f32 %v1004_v50, %v1003_v18  ;;  %v1036_v41 = vadd.f32 %v1006_v4, %v1005_v0  ;;  %v3079_v4 = vpop.f32.mrf.mxu1 }
 0x110   :  { %v3072_v34 = vpop.eup %2501  ;;  %v922_v33 = vadd.f32 %v921_v49, %v920_v21  ;;  %v1016_v30 = vrot.slane %v1015_v29, 4  ;;  %v1023_v40 = vrot.slane %v1022_v22, 4  ;;  %vm849_vm7 = vweird.f32 %v2985_v63  ;;  %4060 = vst [vmem:[#allocation59_spill] sm:$0xff] %v3079_v4  ;;  %v3081_v21 = vpop.f32.mrf.mxu2 }
 0x111   :  { %v1043_v53 = vadd.f32 %v1008_v52, %v1007_v37  ;;  %v941_v25 = vadd.f32 %v940_v59, %v939_v24  ;;  %v981_v39 = vsel %vm861_vm1, %v915_v5, %v908_v20  ;;  %v995_v45 = vrot.slane %v994_v35, 2  ;;  %4061 = vst [vmem:[#allocation60_spill] sm:$0xff] %v3081_v21 }
 0x112   :  { %v1010_v54 = vmul.f32 %v3033_v43, %v2994_v58  ;;  %v846_v23 = vsub.f32 1.5, %v3035_v13  ;;  %v935_v51 = vrot.slane %v934_v6, 1  ;;  %v947_v18 = vrot.slane %v946_v44, 2 }
 0x113   :  { %v952_v0 = vrot.slane %v951_v26, 4  ;;  %vm848_vm8 = vweird.f32 %v2945_v46  ;;  %v963_v24 = vmul.f32 %v3072_v34, %v3040_v27  ;;  %v1009_v5 = vmul.f32 %v3025_v62, %v2956_v9  ;;  %v3094_v9 = vpop.f32.mrf.mxu3 }
 0x114   :  { %v1030_v59 = vrot.slane %v1029_v31, 4  ;;  %v1037_v8 = vrot.slane %v1036_v41, 4  ;;  %v982_v49 = vsel %vm863_vm2, %v922_v33, %v981_v39  ;;  %v1017_v13 = vadd.f32 %v1016_v30, %v1015_v29  ;;  %vm3109_vm9 = vmor %vm848_vm8, %vm849_vm7 }
 0x115   :  { %v1024_v50 = vadd.f32 %v1023_v40, %v1022_v22  ;;  %v1044_v20 = vrot.slane %v1043_v53, 4  ;;  %v929_v52 = vadd.f32 %v928_v38, %v927_v28  ;;  %v942_v37 = vrot.slane %v941_v25, 1  ;;  %v3098_v28 = vpop.f32.mrf.mxu0 }
 0x116   :  { %v996_v61 = vadd.f32 %v995_v45, %v994_v35  ;;  %v1050_v58 = vadd.f32 %v1010_v54, %v1009_v5  ;;  %v3090_v17 = vmul.f32 %v2985_v63, %v846_v23  ;;  %v948_v7 = vadd.f32 %v947_v18, %v946_v44  ;;  %4062 = vst [vmem:[#allocation61_spill] sm:$0xff] %v3098_v28 }
 0x117   :  { %v953_v3 = vadd.f32 %v952_v0, %v951_v26  ;;  %v744_v2 = vadd.f32 %v3006_v47, %v3067_v1  ;;  %v964_v57 = vmul.f32 %v3072_v34, %v963_v24  ;;  %v983_v29 = vsel %vm865_vm3, %v929_v52, %v982_v49  ;;  %v3114_v5 = vpop.f32.mrf.mxu1 }
 0x118   :  { %v1031_v22 = vadd.f32 %v1030_v59, %v1029_v31  ;;  %v1038_v33 = vadd.f32 %v1037_v8, %v1036_v41  ;;  %v936_v35 = vadd.f32 %v935_v51, %v934_v6  ;;  %v1018_v38 = vrot.slane %v1017_v13, 2  ;;  %4065 = vst [vmem:[#allocation62_spill] sm:$0xff] %v3114_v5 }
 0x119   :  { %v1025_v30 = vrot.slane %v1024_v50, 2  ;;  %v1045_v40 = vadd.f32 %v1044_v20, %v1043_v53  ;;  %v943_v39 = vadd.f32 %v942_v37, %v941_v25  ;;  %v958_v26 = vadd.f32 1.0, %v3017_v55 }
 0x11a   :  { %v997_v44 = vrot.slane %v996_v61, 1  ;;  %v1051_v45 = vrot.slane %v1050_v58, 4  ;;  %v954_v47 = vrot.slane %v953_v3, 2  ;;  %v984_v54 = vsel %vm867_vm4, %v936_v35, %v983_v29 }
 0x11b   :  { %v745_v23 = vadd.f32 %v744_v2, %v3079_v4  ;;  %v751_v31 = vadd.f32 %v3011_v48, %v3098_v28  ;;  %v949_v41 = vrot.slane %v948_v7, 1  ;;  %v965_v18 = vmul.f32 0.5, %v964_v57  ;;  %v3116_v48 = vpop.f32.mrf.mxu2 }
 0x11c   :  { %v1032_v0 = vrot.slane %v1031_v22, 2  ;;  %v1039_v6 = vrot.slane %v1038_v33, 2  ;;  %v1019_v53 = vadd.f32 %v1018_v38, %v1017_v13  ;;  %v1026_v51 = vadd.f32 %v1025_v30, %v1024_v50  ;;  %4066 = vst [vmem:[#allocation63_spill] sm:$0xff] %v3116_v48 }
 0x11d   :  { %v1046_v24 = vrot.slane %v1045_v40, 2  ;;  %v746_v2 = vadd.f32 %v745_v23, %v3081_v21  ;;  %v3122_v59 = vadd.f32 %v997_v44, %v996_v61  ;;  %v1052_v46 = vadd.f32 %v1051_v45, %v1050_v58  ;;  %v3134_v58 = vpop.f32.mrf.mxu3 }
 0x11e   :  { %v752_v8 = vadd.f32 %v751_v31, %v3114_v5  ;;  %v3125_v49 = vadd.f32 %v954_v47, %v953_v3  ;;  %2503 = vrcp.f32 %v958_v26  ;;  %v985_v13 = vsel %vm869_vm5, %v943_v39, %v984_v54  ;;  %4067 = vst [vmem:[#allocation64_spill] sm:$0xff] %v3134_v58 }
 0x11f   :  { %v747_v50 = vadd.f32 %v746_v2, %v3094_v9  ;;  %v950_v20 = vadd.f32 %v949_v41, %v948_v7  ;;  %v966_v52 = vsub.f32 1.5, %v965_v18  ;;  %v1033_v37 = vadd.f32 %v1032_v0, %v1031_v22 }
 0x120   :  { %v753_v29 = vadd.f32 %v752_v8, %v3116_v48  ;;  %v1020_v35 = vrot.slane %v1019_v53, 1  ;;  %v1027_v38 = vrot.slane %v1026_v51, 1  ;;  %v3130_v30 = vadd.f32 %v1039_v6, %v1038_v33 }
 0x121   :  { %v3132_v61 = vadd.f32 %v1046_v24, %v1045_v40  ;;  %v1053_v3 = vrot.slane %v1052_v46, 2  ;;  %v3137_v26 = vadd.f32 1e-08, %v3122_v59  ;;  %v3139_v39 = vmul.f32 0.25, %v747_v50 }
 0x122   :  { %v754_v7 = vadd.f32 %v753_v29, %v3134_v58  ;;  %v3144_v44 = vsel %vm871_vm6, %v950_v20, %v985_v13  ;;  %v1013_v33 = vmul.f32 %v3025_v62, %v2979_v32  ;;  %v1011_v40 = vmul.f32 %v3025_v62, %v2958_v14  ;;  %v4068_v13 = vld [vmem:[#allocation31_spill] sm:$0xff] }
 0x123   :  { %v3151_v45 = vmul.f32 %v3072_v34, %v966_v52  ;;  %v1012_v47 = vmul.f32 %v3033_v43, %v2996_v56  ;;  %v1014_v54 = vmul.f32 %v3033_v43, %v3021_v42  ;;  %v1034_v23 = vrot.slane %v1033_v37, 1  ;;  %v4069_v52 = vld [vmem:[#allocation26_spill] sm:$0xff] }
 0x124   :  { %v3157_v31 = vpop.eup %2503  ;;  %v3159_v41 = vadd.f32 %v1020_v35, %v1019_v53  ;;  %v756_v6 = vmul.f32 0.25, %v754_v7  ;;  %v3163_v62 = vadd.f32 %v1027_v38, %v1026_v51  ;;  %v3165_v24 = vadd.f32 %v1053_v3, %v1052_v46  ;;  %v4070_v38 = vld [vmem:[#allocation27_spill] sm:$0xff] }
 0x125   :  { %2505 = vrsqrt.f32 %v3137_v26  ;;  %v1103_v2 = vmul.f32 %v3139_v39, %v3139_v39  ;;  %v1057_v20 = vadd.f32 %v1012_v47, %v1011_v40  ;;  %v1112_v29 = vmul.f32 %v3139_v39, %v4069_v52 }
 0x126   :  { %v1104_v43 = vmul.f32 %v756_v6, %v756_v6  ;;  %v1113_v8 = vmul.f32 %v756_v6, %v2802_v12  ;;  %v1115_v53 = vmul.f32 %v756_v6, %v4068_v13  ;;  %v1117_v50 = vmul.f32 %v756_v6, %v2808_v15 }
 0x127   :  { %v1119_v51 = vmul.f32 %v756_v6, %v2810_v16  ;;  %v1121_v46 = vmul.f32 %v756_v6, %v3098_v28  ;;  %v1114_v3 = vmul.f32 %v3139_v39, %v4070_v38  ;;  %v1116_v7 = vmul.f32 %v3139_v39, %v2798_v10 }
 0x128   :  { %v1105_v35 = vadd.f32 %v1104_v43, %v1103_v2  ;;  %v1118_v57 = vmul.f32 %v3139_v39, %v2800_v11  ;;  %v3183_v22 = vadd.f32 %v1034_v23, %v1033_v37  ;;  %v1120_v40 = vmul.f32 %v3139_v39, %v3067_v1 }
 0x129   :  { %v1123_v47 = vmul.f32 %v756_v6, %v3114_v5  ;;  %v1128_v0 = vadd.f32 %v1113_v8, %v1112_v29  ;;  %v1135_v28 = vadd.f32 %v1115_v53, %v1114_v3  ;;  %v1142_v2 = vadd.f32 %v1117_v50, %v1116_v7 }
 0x12a   :  { %v1106_v18 = vrot.slane %v1105_v35, 4  ;;  %v1149_v43 = vadd.f32 %v1119_v51, %v1118_v57  ;;  %v1064_v15 = vadd.f32 %v1014_v54, %v1013_v33  ;;  %v1122_v10 = vmul.f32 %v3139_v39, %v3079_v4 }
 0x12b   :  { %v3188_v16 = vpop.eup %2505  ;;  %v1129_v12 = vrot.slane %v1128_v0, 4  ;;  %v1156_v11 = vadd.f32 %v1121_v46, %v1120_v40  ;;  %v1136_v23 = vrot.slane %v1135_v28, 4  ;;  %v1143_v13 = vrot.slane %v1142_v2, 4 }
 0x12c   :  { %v1107_v37 = vadd.f32 %v1106_v18, %v1105_v35  ;;  %v1150_v52 = vrot.slane %v1149_v43, 4  ;;  %v1058_v1 = vrot.slane %v1057_v20, 4  ;;  %v1163_v8 = vadd.f32 %v1123_v47, %v1122_v10 }
 0x12d   :  { %v1130_v38 = vadd.f32 %v1129_v12, %v1128_v0  ;;  %v1157_v5 = vrot.slane %v1156_v11, 4  ;;  %v1125_v53 = vmul.f32 %v756_v6, %v3116_v48  ;;  %v1137_v57 = vadd.f32 %v1136_v23, %v1135_v28 }
 0x12e   :  { %v1108_v29 = vrot.slane %v1107_v37, 2  ;;  %v1144_v50 = vadd.f32 %v1143_v13, %v1142_v2  ;;  %v1065_v51 = vrot.slane %v1064_v15, 4  ;;  %v1076_v33 = vmul.f32 %v3188_v16, %v3137_v26 }
 0x12f   :  { %v1131_v54 = vrot.slane %v1130_v38, 2  ;;  %v1151_v3 = vadd.f32 %v1150_v52, %v1149_v43  ;;  %vm969_vm10 = vweird.f32 %v3072_v34  ;;  %v1124_v46 = vmul.f32 %v3139_v39, %v3081_v21 }
 0x130   :  { %v1109_v18 = vadd.f32 %v1108_v29, %v1107_v37  ;;  %v1138_v12 = vrot.slane %v1137_v57, 2  ;;  %v1145_v0 = vrot.slane %v1144_v50, 2  ;;  %v1127_v10 = vmul.f32 %v756_v6, %v3134_v58 }
 0x131   :  { %v1132_v35 = vadd.f32 %v1131_v54, %v1130_v38  ;;  %v1158_v7 = vadd.f32 %v1157_v5, %v1156_v11  ;;  %v1164_v28 = vrot.slane %v1163_v8, 4  ;;  %vm968_vm11 = vweird.f32 %v3040_v27 }
 0x132   :  { %v1110_v13 = vrot.slane %v1109_v18, 1  ;;  %v1139_v40 = vadd.f32 %v1138_v12, %v1137_v57  ;;  %v1146_v47 = vadd.f32 %v1145_v0, %v1144_v50  ;;  %v1170_v2 = vadd.f32 %v1125_v53, %v1124_v46  ;;  %vm3223_vm12 = vmor %vm968_vm11, %vm969_vm10 }
 0x133   :  { %v1059_v52 = vadd.f32 %v1058_v1, %v1057_v20  ;;  %v1077_v43 = vmul.f32 %v3188_v16, %v1076_v33  ;;  %v1133_v37 = vrot.slane %v1132_v35, 1  ;;  %v1152_v23 = vrot.slane %v1151_v3, 2 }
 0x134   :  { %v1126_v29 = vmul.f32 %v3139_v39, %v3094_v9  ;;  %v3203_v48 = vadd.f32 %v1110_v13, %v1109_v18  ;;  %v1140_v6 = vrot.slane %v1139_v40, 1  ;;  %v1171_v38 = vrot.slane %v1170_v2, 4 }
 0x135   :  { %v4071_v11 = vrot.slane %v3130_v30, 1  ;;  %v1071_v57 = vadd.f32 1.0, %v3122_v59  ;;  %v1094_v1 = vsel %vm861_vm1, %v3163_v62, %v3159_v41  ;;  %v1165_v20 = vadd.f32 %v1164_v28, %v1163_v8 }
 0x136   :  { %v1066_v53 = vadd.f32 %v1065_v51, %v1064_v15  ;;  %v1147_v50 = vrot.slane %v1146_v47, 1  ;;  %v1159_v33 = vrot.slane %v1158_v7, 2  ;;  %v1177_v54 = vadd.f32 %v1127_v10, %v1126_v29 }
 0x137   :  { %v1042_v5 = vadd.f32 %v4071_v11, %v3130_v30  ;;  %v1078_v39 = vmul.f32 0.5, %v1077_v43  ;;  %v1134_v18 = vadd.f32 %v1133_v37, %v1132_v35  ;;  %v1141_v46 = vadd.f32 %v1140_v6, %v1139_v40 }
 0x138   :  { %v1153_v12 = vadd.f32 %v1152_v23, %v1151_v3  ;;  %v1060_v0 = vrot.slane %v1059_v52, 2  ;;  %v1172_v13 = vadd.f32 %v1171_v38, %v1170_v2  ;;  %v1178_v58 = vrot.slane %v1177_v54, 4 }
 0x139   :  { %v3213_v30 = vadd.f32 1e-08, %v3203_v48  ;;  %v1055_v11 = vrot.slane %v3165_v24, 1  ;;  %2507 = vrcp.f32 %v1071_v57  ;;  %v1095_v41 = vsel %vm863_vm2, %v3183_v22, %v1094_v1 }
 0x13a   :  { %v1166_v15 = vrot.slane %v1165_v20, 2  ;;  %v1067_v62 = vrot.slane %v1066_v53, 2  ;;  %v1148_v8 = vadd.f32 %v1147_v50, %v1146_v47  ;;  %v1160_v51 = vadd.f32 %v1159_v33, %v1158_v7 }
 0x13b   :  { %2509 = vrsqrt.f32 %v3213_v30  ;;  %v1079_v10 = vsub.f32 1.5, %v1078_v39  ;;  %v1154_v35 = vrot.slane %v1153_v12, 1  ;;  %v1179_v28 = vadd.f32 %v1178_v58, %v1177_v54 }
 0x13c   :  { %v1207_v40 = vsel %vm861_vm1, %v1141_v46, %v1134_v18  ;;  %v960_v22 = vmul.f32 %v3157_v31, %v3017_v55  ;;  %v971_v7 = vsel %vm3223_vm12, %v3072_v34, %v3151_v45  ;;  %v1061_v47 = vadd.f32 %v1060_v0, %v1059_v52 }
 0x13d   :  { %v1173_v2 = vrot.slane %v1172_v13, 2  ;;  %v4074_v27 = vrot.slane %v3132_v61, 1  ;;  %v1096_v37 = vsel %vm865_vm3, %v1042_v5, %v1095_v41  ;;  %v1167_v58 = vadd.f32 %v1166_v15, %v1165_v20 }
 0x13e   :  { %v1184_v23 = vadd.f32 1.0, %v3203_v48  ;;  %v1056_v29 = vadd.f32 %v1055_v11, %v3165_v24  ;;  %v1068_v55 = vadd.f32 %v1067_v62, %v1066_v53  ;;  %v1161_v31 = vrot.slane %v1160_v51, 1 }
 0x13f   :  { %v1049_v43 = vadd.f32 %v4074_v27, %v3132_v61  ;;  %v1208_v6 = vsel %vm863_vm2, %v1148_v8, %v1207_v40  ;;  %v2508_v38 = vpop.eup %2507  ;;  %v1080_v34 = vmul.f32 %v3188_v16, %v1079_v10  ;;  %vm1082_vm14 = vweird.f32 %v3188_v16 }
 0x140   :  { %v1155_v45 = vadd.f32 %v1154_v35, %v1153_v12  ;;  %v1180_v52 = vrot.slane %v1179_v28, 2  ;;  %v1062_v61 = vrot.slane %v1061_v47, 1  ;;  %vm1081_vm15 = vweird.f32 %v3137_v26 }
 0x141   :  { %v2510_v57 = vpop.eup %2509  ;;  %v1097_v5 = vsel %vm867_vm4, %v1049_v43, %v1096_v37  ;;  %v1174_v1 = vadd.f32 %v1173_v2, %v1172_v13  ;;  %v1168_v20 = vrot.slane %v1167_v58, 1  ;;  %2511 = vrcp.f32 %v1184_v23  ;;  %vm3252_vm0 = vmor %vm1081_vm15, %vm1082_vm14 }
 0x142   :  { %v1189_v24 = vmul.f32 %v2510_v57, %v3213_v30  ;;  %v1209_v53 = vsel %vm865_vm3, %v1155_v45, %v1208_v6  ;;  %v4075_v50 = vrot.slane %v3125_v49, 1  ;;  %v972_v54 = vmul.f32 %v971_v7, %v960_v22 }
 0x143   :  { %v1069_v39 = vrot.slane %v1068_v55, 1  ;;  %v1162_v26 = vadd.f32 %v1161_v31, %v1160_v51  ;;  %v1084_v46 = vsel %vm3252_vm0, %v3188_v16, %v1080_v34  ;;  %v1098_v12 = vsel %vm869_vm5, %v1056_v29, %v1097_v5 }
 0x144   :  { %v957_v33 = vadd.f32 %v4075_v50, %v3125_v49  ;;  %v1181_v0 = vadd.f32 %v1180_v52, %v1179_v28  ;;  %v1190_v13 = vmul.f32 %v2510_v57, %v1189_v24  ;;  %v1063_v11 = vadd.f32 %v1062_v61, %v1061_v47 }
 0x145   :  { %v1073_v49 = vmul.f32 %v2508_v38, %v3122_v59  ;;  %v1175_v41 = vrot.slane %v1174_v1, 1  ;;  %v1210_v15 = vsel %vm867_vm4, %v1162_v26, %v1209_v53  ;;  %v4078_v62 = vrot.slane %v3023_v36, 1 }
 0x146   :  { %v4079_v16 = vsel %vm3109_vm9, %v2985_v63, %v3090_v17  ;;  %v1169_v3 = vadd.f32 %v1168_v20, %v1167_v58  ;;  %v1191_v10 = vmul.f32 0.5, %v1190_v13  ;;  %v987_v35 = vsel %vm873_vm13, %v957_v33, %v3144_v44 }
 0x147   :  { %v837_v8 = vadd.f32 %v4078_v62, %v3023_v36  ;;  %v852_v51 = vmul.f32 %v4079_v16, %v3029_v60  ;;  %v1070_v59 = vadd.f32 %v1069_v39, %v1068_v55  ;;  %v1085_v28 = vmul.f32 %v1084_v46, %v1073_v49  ;;  %v2512_v22 = vpop.eup %2511  ;;  %v4085_v62 = vld [vmem:[#allocation2_spill] sm:$0xff]  ;;  %v4086_v16 = vld [vmem:[#allocation7_spill] sm:$0xff] }
 0x148   :  { %v1099_v40 = vsel %vm871_vm6, %v1063_v11, %v1098_v12  ;;  %v1182_v7 = vrot.slane %v1181_v0, 1  ;;  %v1192_v47 = vsub.f32 1.5, %v1191_v10  ;;  %vm1195_vm7 = vweird.f32 %v2510_v57  ;;  %v4084_v11 = vld [vmem:[#allocation3_spill] sm:$0xff]  ;;  %v4087_v10 = vld [vmem:[#allocation6_spill] sm:$0xff] }
 0x149   :  { %v1211_v36 = vsel %vm869_vm5, %v1169_v3, %v1210_v15  ;;  %v3275_v25 = vmul.f32 %v987_v35, %v972_v54  ;;  %v1176_v2 = vadd.f32 %v1175_v41, %v1174_v1  ;;  %v874_v63 = vsel %vm873_vm13, %v837_v8, %v3015_v19 }
 0x14a   :  { %v1100_v17 = vsel %vm873_vm13, %v1070_v59, %v1099_v40  ;;  %v1193_v60 = vmul.f32 %v2510_v57, %v1192_v47  ;;  %vm1194_vm8 = vweird.f32 %v3213_v30  ;;  %v3281_v44 = vmul.f32 %v874_v63, %v852_v51  ;;  %v4088_v47 = vld [vmem:[#allocation4_spill] sm:$0xff] }
 0x14b   :  { %4080 = vst [vmem:[#allocation65_spill] sm:$0xff] %v3275_v25  ;;  %v3283_v27 = vmul.f32 %v1100_v17, %v1085_v28  ;;  %v1186_v43 = vmul.f32 %v2512_v22, %v3203_v48  ;;  %vm1196_vm9 = vmor %vm1194_vm8, %vm1195_vm7  ;;  %v1212_v37 = vsel %vm871_vm6, %v1176_v2, %v1211_v36  ;;  %v1183_v58 = vadd.f32 %v1182_v7, %v1181_v0  ;;  %v4089_v17 = vld [vmem:[#allocation8_spill] sm:$0xff] }
 0x14c   :  { %4081 = vst [vmem:[#allocation66_spill] sm:$0xff] %v3281_v44  ;;  %v1197_v23 = vsel %vm1196_vm9, %v2510_v57, %v1193_v60  ;;  %v1216_v29 = vmax.f32 %v3281_v44, %v3275_v25 }
 0x14d   :  { %4082 = vst [vmem:[#allocation67_spill] sm:$0xff] %v3283_v27  ;;  %v1198_v19 = vmul.f32 %v1197_v23, %v1186_v43  ;;  %v1213_v55 = vsel %vm873_vm13, %v1183_v58, %v1212_v37  ;;  %v4090_v37 = vld [vmem:[#allocation11_spill] sm:$0xff] }
 0x14e   :  { %v1217_v30 = vmax.f32 %v1216_v29, %v3283_v27  ;;  %v4091_v23 = vld [vmem:[#allocation15_spill] sm:$0xff] }
 0x14f   :  { %v3290_v31 = vmul.f32 %v1213_v55, %v1198_v19 }
 0x151   :  { %4083 = vst [vmem:[#allocation68_spill] sm:$0xff] %v3290_v31  ;;  %v1218_v6 = vmax.f32 %v1217_v30, %v3290_v31 }
 0x153   :  { %v1219_v38 = vsub.f32 %v3281_v44, %v1218_v6  ;;  %v1222_v48 = vsub.f32 %v3275_v25, %v1218_v6  ;;  %v1225_v34 = vsub.f32 %v3283_v27, %v1218_v6  ;;  %v1228_v45 = vsub.f32 %v3290_v31, %v1218_v6  ;;  %v4108_v27 = vld [vmem:[#allocation37_spill] sm:$0xff] }
 0x155   :  { %v1220_v52 = vmul.f32 1.442695, %v1219_v38  ;;  %v1223_v57 = vmul.f32 1.442695, %v1222_v48  ;;  %v1226_v61 = vmul.f32 1.442695, %v1225_v34 }
 0x156   :  { %v1229_v5 = vmul.f32 1.442695, %v1228_v45  ;;  %v4092_v38 = vld [vmem:[#allocation5_spill] sm:$0xff]  ;;  %v4093_v45 = vld [vmem:[#allocation10_spill] sm:$0xff] }
 0x157   :  { %2513 = vpow2.f32 %v1220_v52 }
 0x158   :  { %2515 = vpow2.f32 %v1223_v57  ;;  %v4094_v57 = vld [vmem:[#allocation14_spill] sm:$0xff] }
 0x159   :  { %2517 = vpow2.f32 %v1226_v61 }
 0x15a   :  { %2519 = vpow2.f32 %v1229_v5 }
 0x15d   :  { %v2514_v1 = vpop.eup %2513 }
 0x15e   :  { %v2516_v20 = vpop.eup %2515 }
 0x15f   :  { %v1231_v24 = vadd.f32 %v2516_v20, %v2514_v1  ;;  %v2518_v53 = vpop.eup %2517 }
 0x160   :  { %v3298_v33 = vpop.eup %2519 }
 0x161   :  { %v1232_v50 = vadd.f32 %v2518_v53, %v1231_v24 }
 0x163   :  { %v1233_v54 = vadd.f32 %v3298_v33, %v1232_v50 }
 0x165   :  { %2521 = vrcp.f32 %v1233_v54 }
 0x16b   :  { %v3301_v39 = vpop.eup %2521 }
 0x16c   :  { %v1235_v18 = vmul.f32 %v3301_v39, %v2514_v1  ;;  %v3305_v12 = vmul.f32 %v3301_v39, %v2516_v20  ;;  %v3323_v5 = vmul.f32 %v3301_v39, %v2518_v53  ;;  %v4095_v20 = vld [vmem:[#allocation9_spill] sm:$0xff] }
 0x16e   :  { %v1240_v26 = vrot.slane %v1235_v18, 1  ;;  %v1241_v0 = vrot.slane %v1235_v18, 2  ;;  %v1247_v13 = vperm.slane %v1235_v18, 0  ;;  %v1242_v41 = vrot.slane %v1235_v18, 3 }
 0x16f   :  { %v1294_v3 = vrot.slane %v3305_v12, 1  ;;  %v1243_v40 = vrot.slane %v1235_v18, 4  ;;  %v1295_v22 = vrot.slane %v3305_v12, 2  ;;  %v1301_v63 = vperm.slane %v3305_v12, 0 }
 0x170   :  { %v1248_v46 = vperm.slane %v1240_v26, 0  ;;  %v1249_v15 = vperm.slane %v1241_v0, 0  ;;  %v1263_v8 = vmul.f32 %v1247_v13, %v4085_v62  ;;  %v1264_v35 = vmul.f32 %v1247_v13, %v4087_v10  ;;  %v4096_v13 = vld [vmem:[#allocation12_spill] sm:$0xff] }
 0x171   :  { %v1302_v28 = vperm.slane %v1294_v3, 0  ;;  %v1250_v7 = vperm.slane %v1242_v41, 0  ;;  %v1244_v19 = vrot.slane %v1235_v18, 5  ;;  %v1251_v55 = vperm.slane %v1243_v40, 0  ;;  %v4097_v41 = vld [vmem:[#allocation16_spill] sm:$0xff]  ;;  %v4098_v3 = vld [vmem:[#allocation34_spill] sm:$0xff] }
 0x172   :  { %v1265_v49 = vmul.f32 %v1248_v46, %v4084_v11  ;;  %v1266_v51 = vmul.f32 %v1248_v46, %v4086_v16  ;;  %v1267_v36 = vmul.f32 %v1249_v15, %v4088_v47  ;;  %v1268_v60 = vmul.f32 %v1249_v15, %v4089_v17 }
 0x173   :  { %v1319_v58 = vmul.f32 %v1302_v28, %v4090_v37  ;;  %v1320_v29 = vmul.f32 %v1302_v28, %v4091_v23  ;;  %v1296_v30 = vrot.slane %v3305_v12, 3  ;;  %v1303_v6 = vperm.slane %v1295_v22, 0  ;;  %v4099_v22 = vld [vmem:[#allocation38_spill] sm:$0xff]  ;;  %v4118_v23 = vld [vmem:[#allocation23_spill] sm:$0xff] }
 0x174   :  { %v1279_v59 = vadd.f32 %v1265_v49, %v1263_v8  ;;  %v1286_v2 = vadd.f32 %v1266_v51, %v1264_v35  ;;  %v1269_v48 = vmul.f32 %v1250_v7, %v4092_v38  ;;  %v1317_v52 = vmul.f32 %v1301_v63, %v4093_v45 }
 0x175   :  { %v1318_v61 = vmul.f32 %v1301_v63, %v4094_v57  ;;  %v1245_v1 = vrot.slane %v1235_v18, 6  ;;  %v1270_v24 = vmul.f32 %v1250_v7, %v4095_v20  ;;  %v1297_v46 = vrot.slane %v3305_v12, 4  ;;  %v4121_v57 = vld [vmem:[#allocation24_spill] sm:$0xff] }
 0x176   :  { %v1280_v43 = vadd.f32 %v1279_v59, %v1267_v36  ;;  %v1287_v34 = vadd.f32 %v1286_v2, %v1268_v60  ;;  %v1333_v54 = vadd.f32 %v1319_v58, %v1317_v52  ;;  %v1304_v0 = vperm.slane %v1296_v30, 0 }
 0x177   :  { %v1340_v26 = vadd.f32 %v1320_v29, %v1318_v61  ;;  %v1321_v49 = vmul.f32 %v1303_v6, %v4096_v13  ;;  %v1322_v15 = vmul.f32 %v1303_v6, %v4097_v41  ;;  %v1246_v8 = vrot.slane %v1235_v18, 7  ;;  %v4101_v29 = vld [vmem:[#allocation17_spill] sm:$0xff]  ;;  %v4102_v6 = vld [vmem:[#allocation35_spill] sm:$0xff] }
 0x178   :  { %v1281_v50 = vadd.f32 %v1280_v43, %v1269_v48  ;;  %v1252_v51 = vperm.slane %v1244_v19, 0  ;;  %v1271_v35 = vmul.f32 %v1251_v55, %v4098_v3  ;;  %v1288_v59 = vadd.f32 %v1287_v34, %v1270_v24  ;;  %v4100_v43 = vld [vmem:[#allocation13_spill] sm:$0xff]  ;;  %v4103_v61 = vld [vmem:[#allocation39_spill] sm:$0xff] }
 0x179   :  { %v1253_v53 = vperm.slane %v1245_v1, 0  ;;  %v1334_v28 = vadd.f32 %v1333_v54, %v1321_v49  ;;  %v1341_v40 = vadd.f32 %v1340_v26, %v1322_v15  ;;  %v1272_v7 = vmul.f32 %v1251_v55, %v4099_v22  ;;  %v4104_v54 = vld [vmem:[#allocation36_spill] sm:$0xff] }
 0x17a   :  { %v1282_v36 = vadd.f32 %v1281_v50, %v1271_v35  ;;  %v1298_v2 = vrot.slane %v3305_v12, 5  ;;  %v1299_v63 = vrot.slane %v3305_v12, 6  ;;  %v1305_v60 = vperm.slane %v1297_v46, 0  ;;  %v4105_v46 = vld [vmem:[#allocation40_spill] sm:$0xff]  ;;  %v4106_v35 = vld [vmem:[#allocation42_spill] sm:$0xff] }
 0x17b   :  { %v1323_v58 = vmul.f32 %v1304_v0, %v4100_v43  ;;  %v1324_v30 = vmul.f32 %v1304_v0, %v4101_v29  ;;  %v1348_v18 = vrot.slane %v3323_v5, 1  ;;  %v1254_v19 = vperm.slane %v1246_v8, 0  ;;  %v4116_v29 = vld [vmem:[#allocation45_spill] sm:$0xff] }
 0x17c   :  { %v1273_v48 = vmul.f32 %v1252_v51, %v4102_v6  ;;  %v1289_v34 = vadd.f32 %v1288_v59, %v1272_v7  ;;  %v1300_v52 = vrot.slane %v3305_v12, 7  ;;  %v3340_v55 = vmul.f32 %v3301_v39, %v3298_v33  ;;  %v4107_v59 = vld [vmem:[#allocation46_spill] sm:$0xff]  ;;  %v4109_v33 = vld [vmem:[#allocation41_spill] sm:$0xff] }
 0x17d   :  { %v1274_v1 = vmul.f32 %v1252_v51, %v4103_v61  ;;  %v1335_v24 = vadd.f32 %v1334_v28, %v1323_v58  ;;  %v1342_v50 = vadd.f32 %v1341_v40, %v1324_v30  ;;  %v1275_v26 = vmul.f32 %v1253_v53, %v4104_v54  ;;  %v4111_v30 = vld [vmem:[#allocation47_spill] sm:$0xff]  ;;  %v4117_v43 = vld [vmem:[#allocation49_spill] sm:$0xff] }
 0x17e   :  { %v1276_v0 = vmul.f32 %v1253_v53, %v4105_v46  ;;  %v1283_v49 = vadd.f32 %v1282_v36, %v1273_v48  ;;  %v1306_v15 = vperm.slane %v1298_v2, 0  ;;  %v1307_v8 = vperm.slane %v1299_v63, 0  ;;  %v4110_v2 = vld [vmem:[#allocation43_spill] sm:$0xff] }
 0x17f   :  { %v1325_v31 = vmul.f32 %v1305_v60, %v4106_v35  ;;  %v1326_v7 = vmul.f32 %v1305_v60, %v4107_v59  ;;  %v1356_v12 = vperm.slane %v1348_v18, 0  ;;  %v1277_v25 = vmul.f32 %v1254_v19, %v4108_v27  ;;  %v4112_v18 = vld [vmem:[#allocation44_spill] sm:$0xff] }
 0x180   :  { %v1278_v39 = vmul.f32 %v1254_v19, %v4109_v33  ;;  %v1290_v44 = vadd.f32 %v1289_v34, %v1274_v1  ;;  %v1308_v51 = vperm.slane %v1300_v52, 0  ;;  %v1349_v58 = vrot.slane %v3323_v5, 2  ;;  %v4113_v34 = vld [vmem:[#allocation19_spill] sm:$0xff]  ;;  %v4114_v1 = vld [vmem:[#allocation48_spill] sm:$0xff] }
 0x181   :  { %v1336_v28 = vadd.f32 %v1335_v24, %v1325_v31  ;;  %v1343_v40 = vadd.f32 %v1342_v50, %v1326_v7  ;;  %v1355_v53 = vperm.slane %v3323_v5, 0  ;;  %v1284_v36 = vadd.f32 %v1283_v49, %v1275_v26 }
 0x182   :  { %v1327_v63 = vmul.f32 %v1306_v15, %v4110_v2  ;;  %v1328_v48 = vmul.f32 %v1306_v15, %v4111_v30  ;;  %v1350_v60 = vrot.slane %v3323_v5, 3  ;;  %v1329_v59 = vmul.f32 %v1307_v8, %v4112_v18  ;;  %v4115_v30 = vld [vmem:[#allocation18_spill] sm:$0xff] }
 0x183   :  { %v1351_v35 = vrot.slane %v3323_v5, 4  ;;  %v1352_v19 = vrot.slane %v3323_v5, 5  ;;  %v1373_v31 = vmul.f32 %v1356_v12, %v4113_v34  ;;  %v1291_v52 = vadd.f32 %v1290_v44, %v1276_v0 }
 0x184   :  { %v1330_v24 = vmul.f32 %v1307_v8, %v4114_v1  ;;  %v1353_v50 = vrot.slane %v3323_v5, 6  ;;  %v1354_v26 = vrot.slane %v3323_v5, 7  ;;  %v1337_v49 = vadd.f32 %v1336_v28, %v1327_v63 }
 0x185   :  { %v1344_v7 = vadd.f32 %v1343_v40, %v1328_v48  ;;  %v1357_v15 = vperm.slane %v1349_v58, 0  ;;  %v1371_v2 = vmul.f32 %v1355_v53, %v4115_v30  ;;  %v1331_v18 = vmul.f32 %v1308_v51, %v4116_v29  ;;  %v4119_v40 = vld [vmem:[#allocation22_spill] sm:$0xff]  ;;  %v4120_v30 = vld [vmem:[#allocation20_spill] sm:$0xff] }
 0x186   :  { %v1332_v41 = vmul.f32 %v1308_v51, %v4117_v43  ;;  %v1358_v13 = vperm.slane %v1350_v60, 0  ;;  %v1374_v37 = vmul.f32 %v1356_v12, %v4118_v23  ;;  %v3365_v34 = vadd.f32 %v1284_v36, %v1277_v25  ;;  %v4122_v60 = vld [vmem:[#allocation21_spill] sm:$0xff] }
 0x187   :  { %v1359_v44 = vperm.slane %v1351_v35, 0  ;;  %v1360_v0 = vperm.slane %v1352_v19, 0  ;;  %v1387_v8 = vadd.f32 %v1373_v31, %v1371_v2  ;;  %v3367_v1 = vadd.f32 %v1291_v52, %v1278_v39  ;;  %v4123_v12 = vld [vmem:[#allocation25_spill] sm:$0xff]  ;;  %v4124_v2 = vld [vmem:[#allocation50_spill] sm:$0xff]  ;;  %v4126_v52 = vld [vmem:[#allocation51_spill] sm:$0xff] }
 0x188   :  { %v1361_v5 = vperm.slane %v1353_v50, 0  ;;  %v1362_v28 = vperm.slane %v1354_v26, 0  ;;  %v1372_v58 = vmul.f32 %v1355_v53, %v4119_v40  ;;  %v1338_v63 = vadd.f32 %v1337_v49, %v1329_v59  ;;  %v4125_v19 = vld [vmem:[#allocation53_spill] sm:$0xff]  ;;  %v4127_v59 = vld [vmem:[#allocation55_spill] sm:$0xff] }
 0x189   :  { %v1345_v48 = vadd.f32 %v1344_v7, %v1330_v24  ;;  %v1375_v29 = vmul.f32 %v1357_v15, %v4120_v30  ;;  %v1376_v51 = vmul.f32 %v1357_v15, %v4121_v57  ;;  %v1377_v43 = vmul.f32 %v1358_v13, %v4122_v60  ;;  %v4130_v60 = vld [vmem:[#allocation31_spill] sm:$0xff]  ;;  %v4131_v30 = vld [vmem:[#allocation30_spill] sm:$0xff] }
 0x18a   :  { %v1378_v25 = vmul.f32 %v1358_v13, %v4123_v12  ;;  %v1394_v36 = vadd.f32 %v1374_v37, %v1372_v58  ;;  %v1402_v35 = vrot.slane %v3340_v55, 1  ;;  %v1379_v39 = vmul.f32 %v1359_v44, %v4124_v2 }
 0x18b   :  { %v1380_v31 = vmul.f32 %v1359_v44, %v4125_v19  ;;  %v1381_v50 = vmul.f32 %v1360_v0, %v4126_v52  ;;  %v1388_v53 = vadd.f32 %v1387_v8, %v1375_v29  ;;  %v1382_v24 = vmul.f32 %v1360_v0, %v4127_v59  ;;  %v4129_v52 = vld [vmem:[#allocation26_spill] sm:$0xff] }
 0x18c   :  { %v3380_v26 = vmul.f32 %v1361_v5, %v2958_v14  ;;  %v3383_v49 = vmul.f32 %v1361_v5, %v2996_v56  ;;  %v3386_v13 = vmul.f32 %v1362_v28, %v2979_v32  ;;  %v3388_v37 = vadd.f32 %v1338_v63, %v1331_v18 }
 0x18d   :  { %v3390_v7 = vadd.f32 %v1345_v48, %v1332_v41  ;;  %v3393_v15 = vmul.f32 %v1362_v28, %v3021_v42  ;;  %v1455_v29 = vmul.f32 %v3365_v34, %v3365_v34  ;;  %v1395_v44 = vadd.f32 %v1394_v36, %v1376_v51 }
 0x18e   :  { %v1403_v0 = vrot.slane %v3340_v55, 2  ;;  %v1410_v8 = vperm.slane %v1402_v35, 0  ;;  %v1456_v5 = vmul.f32 %v3367_v1, %v3367_v1  ;;  %v1389_v58 = vadd.f32 %v1388_v53, %v1377_v43 }
 0x18f   :  { %v1404_v32 = vrot.slane %v3340_v55, 3  ;;  %v1405_v18 = vrot.slane %v3340_v55, 4  ;;  %v1406_v41 = vrot.slane %v3340_v55, 5  ;;  %v1409_v28 = vperm.slane %v3340_v55, 0 }
 0x190   :  { %v1457_v63 = vadd.f32 %v1456_v5, %v1455_v29  ;;  %v1464_v48 = vmul.f32 %v3365_v34, %v4085_v62  ;;  %v1465_v51 = vmul.f32 %v3367_v1, %v4087_v10  ;;  %v1466_v36 = vmul.f32 %v3365_v34, %v4084_v11  ;;  %v4128_v62 = vld [vmem:[#allocation27_spill] sm:$0xff] }
 0x191   :  { %v1467_v43 = vmul.f32 %v3367_v1, %v4086_v16  ;;  %v1468_v35 = vmul.f32 %v3365_v34, %v4088_v47  ;;  %v1469_v53 = vmul.f32 %v3367_v1, %v4089_v17  ;;  %v1396_v42 = vadd.f32 %v1395_v44, %v1378_v25 }
 0x192   :  { %v1407_v29 = vrot.slane %v3340_v55, 6  ;;  %v1408_v5 = vrot.slane %v3340_v55, 7  ;;  %v1427_v56 = vmul.f32 %v1410_v8, %v4128_v62  ;;  %v1411_v10 = vperm.slane %v1403_v0, 0 }
 0x193   :  { %v1412_v14 = vperm.slane %v1404_v32, 0  ;;  %v1413_v59 = vperm.slane %v1405_v18, 0  ;;  %v1458_v11 = vrot.slane %v1457_v63, 4  ;;  %v1425_v19 = vmul.f32 %v1409_v28, %v4129_v52 }
 0x194   :  { %v1470_v16 = vmul.f32 %v3365_v34, %v4092_v38  ;;  %v1471_v47 = vmul.f32 %v3367_v1, %v4095_v20  ;;  %v1480_v17 = vadd.f32 %v1465_v51, %v1464_v48  ;;  %v1390_v25 = vadd.f32 %v1389_v58, %v1379_v39  ;;  %v4132_v48 = vld [vmem:[#allocation28_spill] sm:$0xff] }
 0x195   :  { %v1414_v44 = vperm.slane %v1406_v41, 0  ;;  %v1487_v2 = vadd.f32 %v1467_v43, %v1466_v36  ;;  %v1494_v12 = vadd.f32 %v1469_v53, %v1468_v35  ;;  %v1397_v55 = vadd.f32 %v1396_v42, %v1380_v31  ;;  %v4134_v35 = vld [vmem:[#allocation29_spill] sm:$0xff] }
 0x196   :  { %v1428_v62 = vmul.f32 %v1410_v8, %v4130_v60  ;;  %v1441_v0 = vadd.f32 %v1427_v56, %v1425_v19  ;;  %v1481_v32 = vrot.slane %v1480_v17, 4  ;;  %v1459_v18 = vadd.f32 %v1458_v11, %v1457_v63  ;;  %v4133_v19 = vld [vmem:[#allocation32_spill] sm:$0xff]  ;;  %v4135_v60 = vld [vmem:[#allocation33_spill] sm:$0xff] }
 0x197   :  { %v1472_v52 = vmul.f32 %v3365_v34, %v4098_v3  ;;  %v1473_v38 = vmul.f32 %v3367_v1, %v4099_v22  ;;  %v1488_v57 = vrot.slane %v1487_v2, 4  ;;  %v1426_v20 = vmul.f32 %v1409_v28, %v4131_v30  ;;  %v4136_v30 = vld [vmem:[#allocation58_spill] sm:$0xff] }
 0x198   :  { %v1429_v39 = vmul.f32 %v1411_v10, %v4132_v48  ;;  %v1495_v58 = vrot.slane %v1494_v12, 4  ;;  %v1501_v41 = vadd.f32 %v1471_v47, %v1470_v16  ;;  %v1415_v51 = vperm.slane %v1407_v29, 0 }
 0x199   :  { %v1416_v42 = vperm.slane %v1408_v5, 0  ;;  %v1482_v31 = vadd.f32 %v1481_v32, %v1480_v17  ;;  %v1489_v8 = vadd.f32 %v1488_v57, %v1487_v2  ;;  %v1391_v56 = vadd.f32 %v1390_v25, %v1381_v50  ;;  %v4138_v5 = vld [vmem:[#allocation62_spill] sm:$0xff] }
 0x19a   :  { %v1430_v11 = vmul.f32 %v1411_v10, %v4133_v19  ;;  %v1442_v63 = vadd.f32 %v1441_v0, %v1429_v39  ;;  %v1448_v36 = vadd.f32 %v1428_v62, %v1426_v20  ;;  %v1398_v43 = vadd.f32 %v1397_v55, %v1382_v24  ;;  %v4137_v20 = vld [vmem:[#allocation61_spill] sm:$0xff]  ;;  %v4139_v39 = vld [vmem:[#allocation63_spill] sm:$0xff] }
 0x19b   :  { %v1431_v53 = vmul.f32 %v1412_v14, %v4134_v35  ;;  %v1460_v22 = vrot.slane %v1459_v18, 2  ;;  %v1508_v3 = vadd.f32 %v1473_v38, %v1472_v52  ;;  %v1432_v28 = vmul.f32 %v1412_v14, %v4135_v60 }
 0x19c   :  { %v1433_v48 = vmul.f32 %v1413_v59, %v4136_v30  ;;  %v1496_v23 = vadd.f32 %v1495_v58, %v1494_v12  ;;  %v1502_v16 = vrot.slane %v1501_v41, 4  ;;  %v1474_v47 = vmul.f32 %v3365_v34, %v4102_v6 }
 0x19d   :  { %v1475_v17 = vmul.f32 %v3367_v1, %v4103_v61  ;;  %v1483_v10 = vrot.slane %v1482_v31, 2  ;;  %v1490_v57 = vrot.slane %v1489_v8, 2  ;;  %v1392_v62 = vadd.f32 %v1391_v56, %v3380_v26 }
 0x19e   :  { %v1434_v2 = vmul.f32 %v1413_v59, %v4137_v20  ;;  %v1443_v50 = vadd.f32 %v1442_v63, %v1431_v53  ;;  %v1449_v38 = vadd.f32 %v1448_v36, %v1430_v11  ;;  %v1461_v52 = vadd.f32 %v1460_v22, %v1459_v18 }
 0x19f   :  { %v1476_v14 = vmul.f32 %v3365_v34, %v4104_v54  ;;  %v1477_v12 = vmul.f32 %v3367_v1, %v4105_v46  ;;  %v1509_v24 = vrot.slane %v1508_v3, 4  ;;  %v1435_v29 = vmul.f32 %v1414_v44, %v3079_v4  ;;  %v4149_v46 = vld [vmem:[#allocation46_spill] sm:$0xff] }
 0x1a0   :  { %v3447_v25 = vmul.f32 %v1414_v44, %v4138_v5  ;;  %v1497_v55 = vrot.slane %v1496_v23, 2  ;;  %v1503_v0 = vadd.f32 %v1502_v16, %v1501_v41  ;;  %v3450_v26 = vmul.f32 %v1415_v51, %v3081_v21 }
 0x1a1   :  { %v1484_v59 = vadd.f32 %v1483_v10, %v1482_v31  ;;  %v1491_v32 = vadd.f32 %v1490_v57, %v1489_v8  ;;  %v1515_v22 = vadd.f32 %v1475_v17, %v1474_v47  ;;  %v3453_v18 = vadd.f32 %v1398_v43, %v3383_v49 }
 0x1a2   :  { %v3456_v58 = vmul.f32 %v1415_v51, %v4139_v39  ;;  %v1444_v56 = vadd.f32 %v1443_v50, %v1433_v48  ;;  %v1450_v11 = vadd.f32 %v1449_v38, %v1432_v28  ;;  %v1462_v63 = vrot.slane %v1461_v52, 1 }
 0x1a3   :  { %v1478_v44 = vmul.f32 %v3365_v34, %v4108_v27  ;;  %v1510_v36 = vadd.f32 %v1509_v24, %v1508_v3  ;;  %v1522_v41 = vadd.f32 %v1477_v12, %v1476_v14  ;;  %v1479_v53 = vmul.f32 %v3367_v1, %v4109_v33  ;;  %v4140_v34 = vld [vmem:[#allocation64_spill] sm:$0xff]  ;;  %v4142_v33 = vld [vmem:[#allocation11_spill] sm:$0xff] }
 0x1a4   :  { %v1498_v31 = vadd.f32 %v1497_v55, %v1496_v23  ;;  %v1504_v8 = vrot.slane %v1503_v0, 2  ;;  %v1569_v49 = vmul.f32 %v3388_v37, %v3388_v37  ;;  %v3465_v43 = vmul.f32 %v1416_v42, %v3094_v9 }
 0x1a5   :  { %v1485_v51 = vrot.slane %v1484_v59, 1  ;;  %v1492_v48 = vrot.slane %v1491_v32, 1  ;;  %v1516_v28 = vrot.slane %v1515_v22, 4  ;;  %v3468_v16 = vadd.f32 %v1392_v62, %v3386_v13 }
 0x1a6   :  { %v3471_v3 = vmul.f32 %v1416_v42, %v4140_v34  ;;  %v1451_v47 = vadd.f32 %v1450_v11, %v1434_v2  ;;  %v1570_v23 = vmul.f32 %v3390_v7, %v3390_v7  ;;  %v1445_v1 = vadd.f32 %v1444_v56, %v1435_v29  ;;  %v4141_v2 = vld [vmem:[#allocation14_spill] sm:$0xff]  ;;  %v4143_v29 = vld [vmem:[#allocation15_spill] sm:$0xff] }
 0x1a7   :  { %v3475_v17 = vadd.f32 %v1462_v63, %v1461_v52  ;;  %v1511_v10 = vrot.slane %v1510_v36, 2  ;;  %v1523_v57 = vrot.slane %v1522_v41, 4  ;;  %v1499_v50 = vrot.slane %v1498_v31, 1  ;;  %v4144_v63 = vld [vmem:[#allocation12_spill] sm:$0xff] }
 0x1a8   :  { %v1505_v38 = vadd.f32 %v1504_v8, %v1503_v0  ;;  %v1529_v14 = vadd.f32 %v1479_v53, %v1478_v44  ;;  %v1571_v12 = vadd.f32 %v1570_v23, %v1569_v49  ;;  %v1486_v24 = vadd.f32 %v1485_v51, %v1484_v59  ;;  %v4145_v44 = vld [vmem:[#allocation16_spill] sm:$0xff]  ;;  %v4147_v53 = vld [vmem:[#allocation17_spill] sm:$0xff] }
 0x1a9   :  { %v1493_v55 = vadd.f32 %v1492_v48, %v1491_v32  ;;  %v1517_v13 = vadd.f32 %v1516_v28, %v1515_v22  ;;  %v1578_v42 = vmul.f32 %v3388_v37, %v4093_v45  ;;  %v1579_v11 = vmul.f32 %v3390_v7, %v4141_v2  ;;  %v4146_v32 = vld [vmem:[#allocation13_spill] sm:$0xff] }
 0x1aa   :  { %v1572_v62 = vrot.slane %v1571_v12, 4  ;;  %v1580_v52 = vmul.f32 %v3388_v37, %v4142_v33  ;;  %v1581_v56 = vmul.f32 %v3390_v7, %v4143_v29  ;;  %v1582_v0 = vmul.f32 %v3388_v37, %v4144_v63 }
 0x1ab   :  { %v1583_v59 = vmul.f32 %v3390_v7, %v4145_v44  ;;  %v1584_v22 = vmul.f32 %v3388_v37, %v4146_v32  ;;  %v1585_v8 = vmul.f32 %v3390_v7, %v4147_v53  ;;  %v1512_v49 = vadd.f32 %v1511_v10, %v1510_v36  ;;  %v4148_v44 = vld [vmem:[#allocation42_spill] sm:$0xff] }
 0x1ac   :  { %v1524_v51 = vadd.f32 %v1523_v57, %v1522_v41  ;;  %v1530_v48 = vrot.slane %v1529_v14, 4  ;;  %v1573_v28 = vadd.f32 %v1572_v62, %v1571_v12  ;;  %v1500_v23 = vadd.f32 %v1499_v50, %v1498_v31 }
 0x1ad   :  { %v1506_v2 = vrot.slane %v1505_v38, 1  ;;  %v1518_v45 = vrot.slane %v1517_v13, 2  ;;  %v3494_v27 = vadd.f32 1e-08, %v3475_v17  ;;  %v1559_v63 = vsel %vm861_vm1, %v1493_v55, %v1486_v24 }
 0x1ae   :  { %v1574_v29 = vrot.slane %v1573_v28, 2  ;;  %v1586_v33 = vmul.f32 %v3388_v37, %v4148_v44  ;;  %v1594_v32 = vadd.f32 %v1579_v11, %v1578_v42  ;;  %v1587_v53 = vmul.f32 %v3390_v7, %v4149_v46  ;;  %v4150_v44 = vld [vmem:[#allocation43_spill] sm:$0xff] }
 0x1af   :  { %v1601_v36 = vadd.f32 %v1581_v56, %v1580_v52  ;;  %v1608_v41 = vadd.f32 %v1583_v59, %v1582_v0  ;;  %v1615_v10 = vadd.f32 %v1585_v8, %v1584_v22  ;;  %v1452_v31 = vadd.f32 %v1451_v47, %v3447_v25  ;;  %v4151_v56 = vld [vmem:[#allocation47_spill] sm:$0xff] }
 0x1b0   :  { %v1513_v57 = vrot.slane %v1512_v49, 1  ;;  %v1531_v50 = vadd.f32 %v1530_v48, %v1529_v14  ;;  %v1595_v12 = vrot.slane %v1594_v32, 4  ;;  %v1525_v62 = vrot.slane %v1524_v51, 2 }
 0x1b1   :  { %2523 = vrsqrt.f32 %v3494_v27  ;;  %v1575_v24 = vadd.f32 %v1574_v29, %v1573_v28  ;;  %v1602_v55 = vrot.slane %v1601_v36, 4  ;;  %v1507_v54 = vadd.f32 %v1506_v2, %v1505_v38 }
 0x1b2   :  { %v1519_v61 = vadd.f32 %v1518_v45, %v1517_v13  ;;  %v1560_v42 = vsel %vm863_vm2, %v1500_v23, %v1559_v63  ;;  %v1609_v11 = vrot.slane %v1608_v41, 4  ;;  %v1588_v52 = vmul.f32 %v3388_v37, %v4150_v44 }
 0x1b3   :  { %v1589_v0 = vmul.f32 %v3390_v7, %v4151_v56  ;;  %v1616_v25 = vrot.slane %v1615_v10, 4  ;;  %v1622_v47 = vadd.f32 %v1587_v53, %v1586_v33  ;;  %v1532_v14 = vrot.slane %v1531_v50, 2 }
 0x1b4   :  { %v1536_v59 = vadd.f32 1.0, %v3475_v17  ;;  %v1596_v22 = vadd.f32 %v1595_v12, %v1594_v32  ;;  %v1603_v8 = vadd.f32 %v1602_v55, %v1601_v36  ;;  %v3511_v38 = vadd.f32 %v3453_v18, %v3393_v15 }
 0x1b5   :  { %v1446_v45 = vadd.f32 %v1445_v1, %v3450_v26  ;;  %v1453_v13 = vadd.f32 %v1452_v31, %v3456_v58  ;;  %v1576_v2 = vrot.slane %v1575_v24, 1  ;;  %v1514_v29 = vadd.f32 %v1513_v57, %v1512_v49  ;;  %v4152_v58 = vld [vmem:[#allocation44_spill] sm:$0xff] }
 0x1b6   :  { %v1520_v63 = vrot.slane %v1519_v61, 1  ;;  %v1561_v48 = vsel %vm865_vm3, %v1507_v54, %v1560_v42  ;;  %v1610_v28 = vadd.f32 %v1609_v11, %v1608_v41  ;;  %v1526_v53 = vadd.f32 %v1525_v62, %v1524_v51  ;;  %v4153_v31 = vld [vmem:[#allocation48_spill] sm:$0xff] }
 0x1b7   :  { %v3516_v33 = vpop.eup %2523  ;;  %v1617_v23 = vadd.f32 %v1616_v25, %v1615_v10  ;;  %v1623_v32 = vrot.slane %v1622_v47, 4  ;;  %v1629_v36 = vadd.f32 %v1589_v0, %v1588_v52  ;;  %v1533_v12 = vadd.f32 %v1532_v14, %v1531_v50  ;;  %v4154_v25 = vld [vmem:[#allocation45_spill] sm:$0xff] }
 0x1b8   :  { %2525 = vrcp.f32 %v1536_v59  ;;  %v1597_v15 = vrot.slane %v1596_v22, 2  ;;  %v1604_v18 = vrot.slane %v1603_v8, 2  ;;  %v1562_v26 = vsel %vm867_vm4, %v1514_v29, %v1561_v48 }
 0x1b9   :  { %v3519_v1 = vadd.f32 %v1576_v2, %v1575_v24  ;;  %v1590_v49 = vmul.f32 %v3388_v37, %v4152_v58  ;;  %v1591_v54 = vmul.f32 %v3390_v7, %v4153_v31  ;;  %v3526_v41 = vadd.f32 %v1446_v45, %v3465_v43 }
 0x1ba   :  { %v1521_v51 = vadd.f32 %v1520_v63, %v1519_v61  ;;  %v1541_v10 = vmul.f32 %v3516_v33, %v3494_v27  ;;  %v1611_v57 = vrot.slane %v1610_v28, 2  ;;  %v1527_v50 = vrot.slane %v1526_v53, 1 }
 0x1bb   :  { %v1618_v62 = vrot.slane %v1617_v23, 2  ;;  %v1624_v55 = vadd.f32 %v1623_v32, %v1622_v47  ;;  %v1630_v42 = vrot.slane %v1629_v36, 4  ;;  %v1534_v24 = vrot.slane %v1533_v12, 1  ;;  %v4155_v47 = vld [vmem:[#allocation49_spill] sm:$0xff] }
 0x1bc   :  { %v1563_v11 = vsel %vm869_vm5, %v1521_v51, %v1562_v26  ;;  %v1598_v52 = vadd.f32 %v1597_v15, %v1596_v22  ;;  %v1605_v0 = vadd.f32 %v1604_v18, %v1603_v8  ;;  %v1592_v14 = vmul.f32 %v3388_v37, %v4154_v25 }
 0x1bd   :  { %v1636_v59 = vadd.f32 %v1591_v54, %v1590_v49  ;;  %v3534_v43 = vadd.f32 1e-08, %v3519_v1  ;;  %v1683_v61 = vmul.f32 %v3468_v16, %v3468_v16  ;;  %v1542_v2 = vmul.f32 %v3516_v33, %v1541_v10 }
 0x1be   :  { %v2526_v45 = vpop.eup %2525  ;;  %v1593_v29 = vmul.f32 %v3390_v7, %v4155_v47  ;;  %v1612_v63 = vadd.f32 %v1611_v57, %v1610_v28  ;;  %v1684_v22 = vmul.f32 %v3511_v38, %v3511_v38  ;;  %v1528_v8 = vadd.f32 %v1527_v50, %v1526_v53 }
 0x1bf   :  { %v1619_v48 = vadd.f32 %v1618_v62, %v1617_v23  ;;  %v1625_v37 = vrot.slane %v1624_v55, 2  ;;  %v1631_v32 = vadd.f32 %v1630_v42, %v1629_v36  ;;  %v3544_v15 = vadd.f32 %v1453_v13, %v3471_v3  ;;  %v4156_v42 = vld [vmem:[#allocation18_spill] sm:$0xff] }
 0x1c0   :  { %v1599_v18 = vrot.slane %v1598_v52, 1  ;;  %v1606_v26 = vrot.slane %v1605_v0, 1  ;;  %2527 = vrsqrt.f32 %v3534_v43  ;;  %v3547_v49 = vadd.f32 %v1534_v24, %v1533_v12 }
 0x1c1   :  { %v3550_v54 = vsel %vm871_vm6, %v1528_v8, %v1563_v11  ;;  %v1637_v7 = vrot.slane %v1636_v59, 4  ;;  %v1685_v28 = vadd.f32 %v1684_v22, %v1683_v61  ;;  %v3553_v51 = vmul.f32 %v2526_v45, %v3475_v17  ;;  %v4157_v22 = vld [vmem:[#allocation19_spill] sm:$0xff]  ;;  %v4160_v8 = vld [vmem:[#allocation24_spill] sm:$0xff] }
 0x1c2   :  { %v1543_v53 = vmul.f32 0.5, %v1542_v2  ;;  %v1613_v23 = vrot.slane %v1612_v63, 1  ;;  %v1643_v36 = vadd.f32 %v1593_v29, %v1592_v14  ;;  %v1620_v10 = vrot.slane %v1619_v48, 1  ;;  %v4158_v45 = vld [vmem:[#allocation23_spill] sm:$0xff] }
 0x1c3   :  { %v1626_v3 = vadd.f32 %v1625_v37, %v1624_v55  ;;  %v1632_v13 = vrot.slane %v1631_v32, 2  ;;  %v1686_v57 = vrot.slane %v1685_v28, 4  ;;  %v1600_v50 = vadd.f32 %v1599_v18, %v1598_v52  ;;  %v4159_v52 = vld [vmem:[#allocation20_spill] sm:$0xff] }
 0x1c4   :  { %v1607_v62 = vadd.f32 %v1606_v26, %v1605_v0  ;;  %v1692_v12 = vmul.f32 %v3468_v16, %v4156_v42  ;;  %v1693_v24 = vmul.f32 %v3511_v38, %v4119_v40  ;;  %v1638_v11 = vadd.f32 %v1637_v7, %v1636_v59  ;;  %v4161_v26 = vld [vmem:[#allocation21_spill] sm:$0xff] }
 0x1c5   :  { %v1687_v61 = vadd.f32 %v1686_v57, %v1685_v28  ;;  %v1694_v17 = vmul.f32 %v3468_v16, %v4157_v22  ;;  %v1695_v14 = vmul.f32 %v3511_v38, %v4158_v45  ;;  %v1614_v55 = vadd.f32 %v1613_v23, %v1612_v63  ;;  %v4162_v28 = vld [vmem:[#allocation25_spill] sm:$0xff]  ;;  %v4163_v23 = vld [vmem:[#allocation50_spill] sm:$0xff] }
 0x1c6   :  { %v3563_v2 = vpop.eup %2527  ;;  %v1644_v29 = vrot.slane %v1643_v36, 4  ;;  %v1696_v0 = vmul.f32 %v3468_v16, %v4159_v52  ;;  %v1697_v37 = vmul.f32 %v3511_v38, %v4160_v8  ;;  %vm1546_vm10 = vweird.f32 %v3494_v27  ;;  %v4164_v40 = vld [vmem:[#allocation53_spill] sm:$0xff] }
 0x1c7   :  { %v1655_v59 = vmul.f32 %v3563_v2, %v3534_v43  ;;  %v1688_v18 = vrot.slane %v1687_v61, 2  ;;  %v1698_v7 = vmul.f32 %v3468_v16, %v4161_v26  ;;  %v1699_v57 = vmul.f32 %v3511_v38, %v4162_v28 }
 0x1c8   :  { %v1673_v63 = vsel %vm861_vm1, %v1607_v62, %v1600_v50  ;;  %v1700_v52 = vmul.f32 %v3468_v16, %v4163_v23  ;;  %v1701_v8 = vmul.f32 %v3511_v38, %v4164_v40  ;;  %v1708_v42 = vadd.f32 %v1693_v24, %v1692_v12 }
 0x1c9   :  { %v1544_v45 = vsub.f32 1.5, %v1543_v53  ;;  %v1633_v47 = vadd.f32 %v1632_v13, %v1631_v32  ;;  %v1639_v22 = vrot.slane %v1638_v11, 2  ;;  %v1715_v25 = vadd.f32 %v1695_v14, %v1694_v17  ;;  %v4165_v14 = vld [vmem:[#allocation51_spill] sm:$0xff] }
 0x1ca   :  { %vm1547_vm11 = vweird.f32 %v3516_v33  ;;  %v1627_v31 = vrot.slane %v1626_v3, 1  ;;  %v1645_v26 = vadd.f32 %v1644_v29, %v1643_v36  ;;  %v1722_v58 = vadd.f32 %v1697_v37, %v1696_v0  ;;  %v4166_v37 = vld [vmem:[#allocation55_spill] sm:$0xff] }
 0x1cb   :  { %v1656_v28 = vmul.f32 %v3563_v2, %v1655_v59  ;;  %v1674_v50 = vsel %vm863_vm2, %v1614_v55, %v1673_v63  ;;  %v1689_v62 = vadd.f32 %v1688_v18, %v1687_v61  ;;  %v1729_v56 = vadd.f32 %v1699_v57, %v1698_v7  ;;  %vm3595_vm12 = vmor %vm1546_vm10, %vm1547_vm11 }
 0x1cc   :  { %v1621_v23 = vadd.f32 %v1620_v10, %v1619_v48  ;;  %v1650_v44 = vadd.f32 1.0, %v3519_v1  ;;  %v1709_v40 = vrot.slane %v1708_v42, 4  ;;  %v1736_v12 = vadd.f32 %v1701_v8, %v1700_v52 }
 0x1cd   :  { %v1545_v32 = vmul.f32 %v3516_v33, %v1544_v45  ;;  %v1634_v53 = vrot.slane %v1633_v47, 1  ;;  %v1640_v13 = vadd.f32 %v1639_v22, %v1638_v11  ;;  %v1716_v24 = vrot.slane %v1715_v25, 4 }
 0x1ce   :  { %v1646_v17 = vrot.slane %v1645_v26, 2  ;;  %v1675_v36 = vsel %vm865_vm3, %v1621_v23, %v1674_v50  ;;  %v1702_v29 = vmul.f32 %v3468_v16, %v4165_v14  ;;  %v1723_v0 = vrot.slane %v1722_v58, 4  ;;  %v4170_v23 = vld [vmem:[#allocation56_spill] sm:$0xff] }
 0x1cf   :  { %v1657_v55 = vmul.f32 0.5, %v1656_v28  ;;  %v1690_v61 = vrot.slane %v1689_v62, 1  ;;  %v1703_v48 = vmul.f32 %v3511_v38, %v4166_v37  ;;  %v1730_v10 = vrot.slane %v1729_v56, 4 }
 0x1d0   :  { %v1628_v22 = vadd.f32 %v1627_v31, %v1626_v3  ;;  %2529 = vrcp.f32 %v1650_v44  ;;  %v1710_v45 = vadd.f32 %v1709_v40, %v1708_v42  ;;  %v1737_v52 = vrot.slane %v1736_v12, 4  ;;  %v4169_v42 = vld [vmem:[#allocation52_spill] sm:$0xff] }
 0x1d1   :  { %v1549_v8 = vsel %vm3595_vm12, %v3516_v33, %v1545_v32  ;;  %v3605_v59 = vsel %vm873_vm13, %v3547_v49, %v3550_v54  ;;  %v1635_v18 = vadd.f32 %v1634_v53, %v1633_v47  ;;  %v1717_v7 = vadd.f32 %v1716_v24, %v1715_v25 }
 0x1d2   :  { %v1641_v27 = vrot.slane %v1640_v13, 1  ;;  %v1647_v28 = vadd.f32 %v1646_v17, %v1645_v26  ;;  %v1676_v57 = vsel %vm867_vm4, %v1628_v22, %v1675_v36  ;;  %v1724_v63 = vadd.f32 %v1723_v0, %v1722_v58 }
 0x1d3   :  { %v1658_v31 = vsub.f32 1.5, %v1657_v55  ;;  %v3608_v44 = vadd.f32 %v1690_v61, %v1689_v62  ;;  %v1731_v40 = vadd.f32 %v1730_v10, %v1729_v56  ;;  %v1743_v3 = vadd.f32 %v1703_v48, %v1702_v29  ;;  %v4171_v61 = vld [vmem:[#allocation54_spill] sm:$0xff] }
 0x1d4   :  { %v1704_v33 = vmul.f32 %v3468_v16, %v4169_v42  ;;  %v1705_v50 = vmul.f32 %v3511_v38, %v4170_v23  ;;  %v1711_v49 = vrot.slane %v1710_v45, 2  ;;  %v1738_v54 = vadd.f32 %v1737_v52, %v1736_v12 }
 0x1d5   :  { %v3615_v25 = vmul.f32 %v1549_v8, %v3553_v51  ;;  %vm1660_vm14 = vweird.f32 %v3534_v43  ;;  %v1677_v58 = vsel %vm869_vm5, %v1635_v18, %v1676_v57  ;;  %v1718_v47 = vrot.slane %v1717_v7, 2 }
 0x1d6   :  { %v2530_v26 = vpop.eup %2529  ;;  %v1642_v62 = vadd.f32 %v1641_v27, %v1640_v13  ;;  %v1648_v56 = vrot.slane %v1647_v28, 1  ;;  %vm1661_vm15 = vweird.f32 %v3563_v2  ;;  %v1725_v32 = vrot.slane %v1724_v63, 2 }
 0x1d7   :  { %v3621_v53 = vmul.f32 %v3563_v2, %v1658_v31  ;;  %v1732_v24 = vrot.slane %v1731_v40, 2  ;;  %v1744_v17 = vrot.slane %v1743_v3, 4  ;;  %v3624_v12 = vadd.f32 1e-08, %v3608_v44  ;;  %vm3642_vm0 = vmor %vm1660_vm14, %vm1661_vm15 }
 0x1d8   :  { %v1712_v51 = vadd.f32 %v1711_v49, %v1710_v45  ;;  %v1739_v36 = vrot.slane %v1738_v54, 2  ;;  %v1750_v29 = vadd.f32 %v1705_v50, %v1704_v33  ;;  %v1797_v0 = vmul.f32 %v3526_v41, %v3526_v41  ;;  %v4174_v45 = vld [vmem:[#allocation57_spill] sm:$0xff]  ;;  %v4176_v33 = vld [vmem:[#allocation30_spill] sm:$0xff]  ;;  %v4177_v49 = vld [vmem:[#allocation27_spill] sm:$0xff] }
 0x1d9   :  { %v3629_v13 = vmul.f32 %v2530_v26, %v3519_v1  ;;  %v3632_v55 = vsel %vm871_vm6, %v1642_v62, %v1677_v58  ;;  %v1706_v48 = vmul.f32 %v3468_v16, %v4171_v61  ;;  %v1719_v10 = vadd.f32 %v1718_v47, %v1717_v7  ;;  %v4179_v26 = vld [vmem:[#allocation28_spill] sm:$0xff] }
 0x1da   :  { %v3636_v11 = vadd.f32 %v1648_v56, %v1647_v28  ;;  %v1707_v1 = vmul.f32 %v3511_v38, %v4174_v45  ;;  %v1726_v52 = vadd.f32 %v1725_v32, %v1724_v63  ;;  %v1798_v8 = vmul.f32 %v3544_v15, %v3544_v15  ;;  %v4175_v63 = vld [vmem:[#allocation26_spill] sm:$0xff] }
 0x1db   :  { %v3654_v18 = vadd.f32 %v1732_v24, %v1731_v40  ;;  %v3656_v7 = vadd.f32 %v1744_v17, %v1743_v3  ;;  %2531 = vrsqrt.f32 %v3624_v12  ;;  %v1713_v43 = vrot.slane %v1712_v51, 1  ;;  %v4178_v3 = vld [vmem:[#allocation31_spill] sm:$0xff] }
 0x1dc   :  { %v3659_v27 = vadd.f32 %v1739_v36, %v1738_v54  ;;  %v1751_v28 = vrot.slane %v1750_v29, 4  ;;  %v1799_v38 = vadd.f32 %v1798_v8, %v1797_v0  ;;  %v1720_v57 = vrot.slane %v1719_v10, 1 }
 0x1dd   :  { %v1806_v31 = vmul.f32 %v3526_v41, %v4175_v63  ;;  %v1807_v50 = vmul.f32 %v3544_v15, %v4176_v33  ;;  %v1808_v40 = vmul.f32 %v3526_v41, %v4177_v49  ;;  %v1809_v47 = vmul.f32 %v3544_v15, %v4178_v3 }
 0x1de   :  { %v1800_v58 = vrot.slane %v1799_v38, 4  ;;  %v1810_v54 = vmul.f32 %v3526_v41, %v4179_v26  ;;  %v1811_v62 = vmul.f32 %v3544_v15, %v4133_v19  ;;  %v1812_v56 = vmul.f32 %v3526_v41, %v4134_v35 }
 0x1df   :  { %v1813_v32 = vmul.f32 %v3544_v15, %v4135_v60  ;;  %v1814_v24 = vmul.f32 %v3526_v41, %v4136_v30  ;;  %v1815_v17 = vmul.f32 %v3544_v15, %v4137_v20  ;;  %v1727_v36 = vrot.slane %v1726_v52, 1 }
 0x1e0   :  { %v1734_v0 = vrot.slane %v3654_v18, 1  ;;  %v1801_v16 = vadd.f32 %v1800_v58, %v1799_v38  ;;  %v1714_v19 = vadd.f32 %v1713_v43, %v1712_v51  ;;  %v1746_v35 = vrot.slane %v3656_v7, 2 }
 0x1e1   :  { %v3683_v26 = vpop.eup %2531  ;;  %v1752_v33 = vadd.f32 %v1751_v28, %v1750_v29  ;;  %v1822_v63 = vadd.f32 %v1807_v50, %v1806_v31  ;;  %v1816_v30 = vmul.f32 %v3526_v41, %v3079_v4  ;;  %v1817_v20 = vmul.f32 %v3544_v15, %v4138_v5 }
 0x1e2   :  { %v1802_v60 = vrot.slane %v1801_v16, 2  ;;  %v1829_v3 = vadd.f32 %v1809_v47, %v1808_v40  ;;  %v1836_v45 = vadd.f32 %v1811_v62, %v1810_v54  ;;  %v1843_v61 = vadd.f32 %v1813_v32, %v1812_v56 }
 0x1e3   :  { %v1823_v49 = vrot.slane %v1822_v63, 4  ;;  %v1850_v8 = vadd.f32 %v1815_v17, %v1814_v24  ;;  %v1721_v38 = vadd.f32 %v1720_v57, %v1719_v10  ;;  %v1757_v58 = vadd.f32 %v1707_v1, %v1706_v48 }
 0x1e4   :  { %v1769_v51 = vmul.f32 %v3683_v26, %v3624_v12  ;;  %v1830_v43 = vrot.slane %v1829_v3, 4  ;;  %v1803_v29 = vadd.f32 %v1802_v60, %v1801_v16  ;;  %v1837_v31 = vrot.slane %v1836_v45, 4 }
 0x1e5   :  { %v1824_v28 = vadd.f32 %v1823_v49, %v1822_v63  ;;  %v1844_v50 = vrot.slane %v1843_v61, 4  ;;  %v1818_v4 = vmul.f32 %v3526_v41, %v3081_v21  ;;  %v1819_v40 = vmul.f32 %v3544_v15, %v4139_v39 }
 0x1e6   :  { %v1831_v47 = vadd.f32 %v1830_v43, %v1829_v3  ;;  %v1857_v54 = vadd.f32 %v1817_v20, %v1816_v30  ;;  %v1728_v62 = vadd.f32 %v1727_v36, %v1726_v52  ;;  %v1838_v10 = vadd.f32 %v1837_v31, %v1836_v45 }
 0x1e7   :  { %v1825_v56 = vrot.slane %v1824_v28, 2  ;;  %v1851_v48 = vrot.slane %v1850_v8, 4  ;;  %v1753_v1 = vrot.slane %v1752_v33, 2  ;;  %v1758_v57 = vrot.slane %v1757_v58, 4 }
 0x1e8   :  { %v1832_v32 = vrot.slane %v1831_v47, 2  ;;  %v1845_v24 = vadd.f32 %v1844_v50, %v1843_v61  ;;  %v1770_v60 = vmul.f32 %v3683_v26, %v1769_v51  ;;  %v1804_v16 = vrot.slane %v1803_v29, 1 }
 0x1e9   :  { %v1826_v63 = vadd.f32 %v1825_v56, %v1824_v28  ;;  %v1839_v49 = vrot.slane %v1838_v10, 2  ;;  %v1787_v17 = vsel %vm861_vm1, %v1721_v38, %v1714_v19  ;;  %v1858_v5 = vrot.slane %v1857_v54, 4 }
 0x1ea   :  { %v1833_v21 = vadd.f32 %v1832_v32, %v1831_v47  ;;  %v1864_v39 = vadd.f32 %v1819_v40, %v1818_v4  ;;  %v1820_v30 = vmul.f32 %v3526_v41, %v3094_v9  ;;  %v1821_v20 = vmul.f32 %v3544_v15, %v4140_v34 }
 0x1eb   :  { %v1840_v45 = vadd.f32 %v1839_v49, %v1838_v10  ;;  %v1852_v52 = vadd.f32 %v1851_v48, %v1850_v8  ;;  %v1759_v3 = vadd.f32 %v1758_v57, %v1757_v58  ;;  %v1827_v61 = vrot.slane %v1826_v63, 1 }
 0x1ec   :  { %v1834_v36 = vrot.slane %v1833_v21, 1  ;;  %v1846_v51 = vrot.slane %v1845_v24, 2  ;;  %v1735_v43 = vadd.f32 %v1734_v0, %v3654_v18  ;;  %v1771_v28 = vmul.f32 0.5, %v1770_v60 }
 0x1ed   :  { %v3703_v31 = vadd.f32 %v1804_v16, %v1803_v29  ;;  %v1865_v19 = vrot.slane %v1864_v39, 4  ;;  %v1747_v4 = vadd.f32 %v1746_v35, %v3656_v7  ;;  %v1754_v38 = vadd.f32 %v1753_v1, %v1752_v33 }
 0x1ee   :  { %v1764_v41 = vadd.f32 1.0, %v3608_v44  ;;  %v1859_v50 = vadd.f32 %v1858_v5, %v1857_v54  ;;  %v1788_v15 = vsel %vm863_vm2, %v1728_v62, %v1787_v17  ;;  %v1841_v40 = vrot.slane %v1840_v45, 1 }
 0x1ef   :  { %v1853_v8 = vrot.slane %v1852_v52, 2  ;;  %v1871_v58 = vadd.f32 %v1821_v20, %v1820_v30  ;;  %v1760_v47 = vrot.slane %v1759_v3, 2  ;;  %v1828_v56 = vadd.f32 %v1827_v61, %v1826_v63 }
 0x1f0   :  { %v1835_v10 = vadd.f32 %v1834_v36, %v1833_v21  ;;  %v1847_v48 = vadd.f32 %v1846_v51, %v1845_v24  ;;  %v1772_v18 = vsub.f32 1.5, %v1771_v28  ;;  %v1866_v0 = vadd.f32 %v1865_v19, %v1864_v39 }
 0x1f1   :  { %v1872_v29 = vrot.slane %v1871_v58, 4  ;;  %v3709_v57 = vadd.f32 1e-08, %v3703_v31  ;;  %v4180_v35 = vrot.slane %v3659_v27, 1  ;;  %v1748_v5 = vrot.slane %v1747_v4, 1 }
 0x1f2   :  { %2533 = vrcp.f32 %v1764_v41  ;;  %v1860_v33 = vrot.slane %v1859_v50, 2  ;;  %v1789_v54 = vsel %vm865_vm3, %v1735_v43, %v1788_v15  ;;  %v1842_v62 = vadd.f32 %v1841_v40, %v1840_v45 }
 0x1f3   :  { %v1742_v7 = vadd.f32 %v4180_v35, %v3659_v27  ;;  %v1854_v1 = vadd.f32 %v1853_v8, %v1852_v52  ;;  %2535 = vrsqrt.f32 %v3709_v57  ;;  %v1755_v21 = vrot.slane %v1754_v38, 1  ;;  %v4185_v35 = vld [vmem:[#allocation65_spill] sm:$0xff] }
 0x1f4   :  { %v1848_v32 = vrot.slane %v1847_v48, 1  ;;  %v1873_v39 = vadd.f32 %v1872_v29, %v1871_v58  ;;  %v1901_v24 = vsel %vm861_vm1, %v1835_v10, %v1828_v56  ;;  %v1761_v60 = vadd.f32 %v1760_v47, %v1759_v3 }
 0x1f5   :  { %v1773_v16 = vmul.f32 %v3683_v26, %v1772_v18  ;;  %vm1775_vm7 = vweird.f32 %v3683_v26  ;;  %v1867_v27 = vrot.slane %v1866_v0, 2  ;;  %v4181_v63 = vsel %vm3642_vm0, %v3563_v2, %v3621_v53 }
 0x1f6   :  { %v1664_v49 = vmul.f32 %v4181_v63, %v3629_v13  ;;  %v1790_v17 = vsel %vm867_vm4, %v1742_v7, %v1789_v54  ;;  %v1861_v30 = vadd.f32 %v1860_v33, %v1859_v50  ;;  %v1878_v20 = vadd.f32 1.0, %v3703_v31 }
 0x1f7   :  { %v1749_v45 = vadd.f32 %v1748_v5, %v1747_v4  ;;  %vm1774_vm1 = vweird.f32 %v3624_v12  ;;  %v1855_v52 = vrot.slane %v1854_v1, 1  ;;  %v1902_v3 = vsel %vm863_vm2, %v1842_v62, %v1901_v24 }
 0x1f8   :  { %v2534_v61 = vpop.eup %2533  ;;  %v1679_v22 = vsel %vm873_vm13, %v3636_v11, %v3632_v55  ;;  %v1756_v36 = vadd.f32 %v1755_v21, %v1754_v38  ;;  %vm3732_vm8 = vmor %vm1774_vm1, %vm1775_vm7  ;;  %v1849_v53 = vadd.f32 %v1848_v32, %v1847_v48  ;;  %v1874_v13 = vrot.slane %v1873_v39, 2 }
 0x1f9   :  { %v2536_v51 = vpop.eup %2535  ;;  %v1762_v43 = vrot.slane %v1761_v60, 1  ;;  %v1777_v12 = vsel %vm3732_vm8, %v3683_v26, %v1773_v16  ;;  %v1791_v28 = vsel %vm869_vm5, %v1749_v45, %v1790_v17  ;;  %v1868_v19 = vadd.f32 %v1867_v27, %v1866_v0  ;;  %v4184_v0 = vld [vmem:[#allocation66_spill] sm:$0xff]  ;;  %v4186_v16 = vld [vmem:[#allocation67_spill] sm:$0xff] }
 0x1fa   :  { %v1862_v4 = vrot.slane %v1861_v30, 1  ;;  %2537 = vrcp.f32 %v1878_v20  ;;  %v1883_v55 = vmul.f32 %v2536_v51, %v3709_v57  ;;  %v1903_v11 = vsel %vm865_vm3, %v1849_v53, %v1902_v3  ;;  %v4187_v20 = vld [vmem:[#allocation68_spill] sm:$0xff] }
 0x1fb   :  { %v1567_v38 = vmul.f32 %v3605_v59, %v3615_v25  ;;  %v1681_v41 = vmul.f32 %v1679_v22, %v1664_v49  ;;  %v1766_v50 = vmul.f32 %v2534_v61, %v3608_v44  ;;  %v1856_v15 = vadd.f32 %v1855_v52, %v1854_v1 }
 0x1fc   :  { %v1792_v40 = vsel %vm871_vm6, %v1756_v36, %v1791_v28  ;;  %v1875_v8 = vadd.f32 %v1874_v13, %v1873_v39  ;;  %v1884_v26 = vmul.f32 %v2536_v51, %v1883_v55  ;;  %v1763_v58 = vadd.f32 %v1762_v43, %v1761_v60 }
 0x1fd   :  { %v1778_v47 = vmul.f32 %v1777_v12, %v1766_v50  ;;  %v1869_v56 = vrot.slane %v1868_v19, 1  ;;  %v1904_v10 = vsel %vm867_vm4, %v1856_v15, %v1903_v11  ;;  %v1863_v48 = vadd.f32 %v1862_v4, %v1861_v30 }
 0x1fe   :  { %v1885_v18 = vmul.f32 0.5, %v1884_v26  ;;  %v1568_v29 = vadd.f32 %v1567_v38, %v4184_v0  ;;  %v1682_v7 = vadd.f32 %v1681_v41, %v4185_v35  ;;  %v1793_v59 = vsel %vm873_vm13, %v1763_v58, %v1792_v40 }
 0x1ff   :  { %v1876_v44 = vrot.slane %v1875_v8, 1  ;;  %vm1889_vm2 = vweird.f32 %v2536_v51  ;;  %v1905_v33 = vsel %vm869_vm5, %v1863_v48, %v1904_v10  ;;  %v1795_v54 = vmul.f32 %v1793_v59, %v1778_v47  ;;  %v4190_v59 = vld [vmem:[#allocation2_spill] sm:$0xff] }
 0x200   :  { %v2538_v25 = vpop.eup %2537  ;;  %v1886_v5 = vsub.f32 1.5, %v1885_v18  ;;  %v1870_v62 = vadd.f32 %v1869_v56, %v1868_v19  ;;  %vm1888_vm3 = vweird.f32 %v3709_v57  ;;  %v1911_v39 = vmax.f32 %v1568_v29, %v1682_v7  ;;  %v4188_v18 = vld [vmem:[#allocation3_spill] sm:$0xff] }
 0x201   :  { %v1880_v21 = vmul.f32 %v2538_v25, %v3703_v31  ;;  %vm1890_vm4 = vmor %vm1888_vm3, %vm1889_vm2  ;;  %v1877_v24 = vadd.f32 %v1876_v44, %v1875_v8  ;;  %v1796_v27 = vadd.f32 %v1795_v54, %v4186_v16  ;;  %v4191_v54 = vld [vmem:[#allocation6_spill] sm:$0xff]  ;;  %vm2186_vm5 = vcmask 1040384  }
 0x202   :  { %v1887_v1 = vmul.f32 %v2536_v51, %v1886_v5  ;;  %v1906_v32 = vsel %vm871_vm6, %v1870_v62, %v1905_v33  ;;  %vm2188_vm6 = vcmask 1041408  }
 0x203   :  { %v1907_v49 = vsel %vm873_vm13, %v1877_v24, %v1906_v32  ;;  %v1912_v30 = vmax.f32 %v1911_v39, %v1796_v27  ;;  %v4192_v32 = vld [vmem:[#allocation4_spill] sm:$0xff]  ;;  %vm2190_vm13 = vcmask 1042432  }
 0x204   :  { %v1891_v60 = vsel %vm1890_vm4, %v2536_v51, %v1887_v1 }
 0x205   :  { %v1892_v63 = vmul.f32 %v1891_v60, %v1880_v21  ;;  %v4193_v60 = vld [vmem:[#allocation8_spill] sm:$0xff] }
 0x207   :  { %v1909_v17 = vmul.f32 %v1907_v49, %v1892_v63 }
 0x209   :  { %v1910_v45 = vadd.f32 %v1909_v17, %v4187_v20 }
 0x20b   :  { %v1913_v52 = vmax.f32 %v1912_v30, %v1910_v45  ;;  %v4195_v30 = vld [vmem:[#allocation9_spill] sm:$0xff] }
 0x20d   :  { %v1914_v3 = vsub.f32 %v1568_v29, %v1913_v52  ;;  %v1917_v57 = vsub.f32 %v1682_v7, %v1913_v52  ;;  %v1920_v61 = vsub.f32 %v1796_v27, %v1913_v52  ;;  %v1923_v31 = vsub.f32 %v1910_v45, %v1913_v52  ;;  %v4189_v29 = vld [vmem:[#allocation7_spill] sm:$0xff]  ;;  %v4194_v27 = vld [vmem:[#allocation5_spill] sm:$0xff]  ;;  %v4196_v45 = vld [vmem:[#allocation34_spill] sm:$0xff] }
 0x20f   :  { %v1915_v22 = vmul.f32 1.442695, %v1914_v3  ;;  %v1918_v36 = vmul.f32 1.442695, %v1917_v57  ;;  %v1921_v2 = vmul.f32 1.442695, %v1920_v61 }
 0x210   :  { %v1924_v53 = vmul.f32 1.442695, %v1923_v31  ;;  %v4197_v61 = vld [vmem:[#allocation38_spill] sm:$0xff] }
 0x211   :  { %2539 = vpow2.f32 %v1915_v22 }
 0x212   :  { %2541 = vpow2.f32 %v1918_v36 }
 0x213   :  { %2543 = vpow2.f32 %v1921_v2 }
 0x214   :  { %2545 = vpow2.f32 %v1924_v53 }
 0x217   :  { %v2540_v13 = vpop.eup %2539 }
 0x218   :  { %v2542_v51 = vpop.eup %2541 }
 0x219   :  { %v1926_v43 = vadd.f32 %v2542_v51, %v2540_v13  ;;  %v2544_v12 = vpop.eup %2543 }
 0x21a   :  { %v2546_v19 = vpop.eup %2545 }
 0x21b   :  { %v1927_v28 = vadd.f32 %v2544_v12, %v1926_v43 }
 0x21d   :  { %v1928_v4 = vadd.f32 %v2546_v19, %v1927_v28 }
 0x21f   :  { %2547 = vrcp.f32 %v1928_v4 }
 0x225   :  { %v2548_v55 = vpop.eup %2547 }
 0x226   :  { %v1930_v11 = vmul.f32 %v2548_v55, %v2540_v13  ;;  %v1931_v10 = vmul.f32 %v2548_v55, %v2542_v51  ;;  %v3760_v44 = vmul.f32 %v2548_v55, %v2544_v12  ;;  %v3762_v5 = vmul.f32 %v2548_v55, %v2546_v19  ;;  %v4198_v13 = vld [vmem:[#allocation39_spill] sm:$0xff] }
 0x228   :  { %v1935_v38 = vrot.slane %v1930_v11, 1  ;;  %v1936_v41 = vrot.slane %v1930_v11, 2  ;;  %v1937_v50 = vrot.slane %v1930_v11, 3  ;;  %v1938_v15 = vrot.slane %v1930_v11, 4 }
 0x229   :  { %v1942_v40 = vperm.slane %v1930_v11, 0  ;;  %v1939_v8 = vrot.slane %v1930_v11, 5  ;;  %v1940_v58 = vrot.slane %v1930_v11, 6  ;;  %v1941_v47 = vrot.slane %v1930_v11, 7  ;;  %v4199_v11 = vld [vmem:[#allocation36_spill] sm:$0xff] }
 0x22a   :  { %v1943_v26 = vperm.slane %v1935_v38, 0  ;;  %v1944_v56 = vperm.slane %v1936_v41, 0  ;;  %v1945_v48 = vperm.slane %v1937_v50, 0  ;;  %v1946_v7 = vperm.slane %v1938_v15, 0 }
 0x22b   :  { %v1958_v25 = vmul.f32 %v1942_v40, %v4190_v59  ;;  %v1947_v33 = vperm.slane %v1939_v8, 0  ;;  %v1959_v62 = vmul.f32 %v1942_v40, %v4191_v54  ;;  %v1948_v1 = vperm.slane %v1940_v58, 0  ;;  %v4200_v40 = vld [vmem:[#allocation40_spill] sm:$0xff]  ;;  %v4201_v58 = vld [vmem:[#allocation11_spill] sm:$0xff] }
 0x22c   :  { %v1960_v0 = vmul.f32 %v1943_v26, %v4188_v18  ;;  %v1961_v35 = vmul.f32 %v1943_v26, %v4189_v29  ;;  %v1949_v21 = vperm.slane %v1941_v47, 0  ;;  %v1962_v39 = vmul.f32 %v1944_v56, %v4192_v32 }
 0x22d   :  { %v1963_v16 = vmul.f32 %v1944_v56, %v4193_v60  ;;  %v1964_v63 = vmul.f32 %v1945_v48, %v4194_v27  ;;  %v1989_v17 = vrot.slane %v1931_v10, 1  ;;  %v1965_v20 = vmul.f32 %v1945_v48, %v4195_v30  ;;  %v4202_v56 = vld [vmem:[#allocation15_spill] sm:$0xff]  ;;  %v4203_v48 = vld [vmem:[#allocation37_spill] sm:$0xff]  ;;  %v4208_v60 = vld [vmem:[#allocation16_spill] sm:$0xff] }
 0x22e   :  { %v1974_v24 = vadd.f32 %v1960_v0, %v1958_v25  ;;  %v1981_v49 = vadd.f32 %v1961_v35, %v1959_v62  ;;  %v1966_v52 = vmul.f32 %v1946_v7, %v4196_v45  ;;  %v1990_v57 = vrot.slane %v1931_v10, 2  ;;  %v4204_v0 = vld [vmem:[#allocation41_spill] sm:$0xff]  ;;  %v4206_v62 = vld [vmem:[#allocation14_spill] sm:$0xff] }
 0x22f   :  { %v1967_v31 = vmul.f32 %v1946_v7, %v4197_v61  ;;  %v1991_v36 = vrot.slane %v1931_v10, 3  ;;  %v1997_v2 = vperm.slane %v1989_v17, 0  ;;  %v1968_v53 = vmul.f32 %v1947_v33, %v4102_v6  ;;  %v4209_v27 = vld [vmem:[#allocation13_spill] sm:$0xff]  ;;  %v4211_v45 = vld [vmem:[#allocation42_spill] sm:$0xff]  ;;  %v4212_v61 = vld [vmem:[#allocation43_spill] sm:$0xff] }
 0x230   :  { %v1975_v3 = vadd.f32 %v1974_v24, %v1962_v39  ;;  %v1982_v22 = vadd.f32 %v1981_v49, %v1963_v16  ;;  %v1969_v51 = vmul.f32 %v1947_v33, %v4198_v13  ;;  %v1992_v12 = vrot.slane %v1931_v10, 4  ;;  %v4205_v33 = vld [vmem:[#allocation10_spill] sm:$0xff]  ;;  %v4210_v49 = vld [vmem:[#allocation17_spill] sm:$0xff] }
 0x231   :  { %v1993_v19 = vrot.slane %v1931_v10, 5  ;;  %v1994_v4 = vrot.slane %v1931_v10, 6  ;;  %v1996_v55 = vperm.slane %v1931_v10, 0  ;;  %v1970_v38 = vmul.f32 %v1948_v1, %v4199_v11 }
 0x232   :  { %v1976_v43 = vadd.f32 %v1975_v3, %v1964_v63  ;;  %v1983_v28 = vadd.f32 %v1982_v22, %v1965_v20  ;;  %v1995_v50 = vrot.slane %v1931_v10, 7  ;;  %v1998_v15 = vperm.slane %v1990_v57, 0  ;;  %v4213_v22 = vld [vmem:[#allocation47_spill] sm:$0xff] }
 0x233   :  { %v1971_v8 = vmul.f32 %v1948_v1, %v4200_v40  ;;  %v1999_v26 = vperm.slane %v1991_v36, 0  ;;  %v2014_v47 = vmul.f32 %v1997_v2, %v4201_v58  ;;  %v2015_v6 = vmul.f32 %v1997_v2, %v4202_v56  ;;  %v4207_v1 = vld [vmem:[#allocation12_spill] sm:$0xff]  ;;  %v4216_v56 = vld [vmem:[#allocation45_spill] sm:$0xff] }
 0x234   :  { %v1977_v41 = vadd.f32 %v1976_v43, %v1966_v52  ;;  %v1972_v18 = vmul.f32 %v1949_v21, %v4203_v48  ;;  %v1973_v29 = vmul.f32 %v1949_v21, %v4204_v0  ;;  %v1984_v35 = vadd.f32 %v1983_v28, %v1967_v31  ;;  %v4214_v43 = vld [vmem:[#allocation44_spill] sm:$0xff] }
 0x235   :  { %v2000_v7 = vperm.slane %v1992_v12, 0  ;;  %v2001_v59 = vperm.slane %v1993_v19, 0  ;;  %v2002_v25 = vperm.slane %v1994_v4, 0  ;;  %v2012_v54 = vmul.f32 %v1996_v55, %v4205_v33 }
 0x236   :  { %v2013_v10 = vmul.f32 %v1996_v55, %v4206_v62  ;;  %v1978_v32 = vadd.f32 %v1977_v41, %v1968_v53  ;;  %v2003_v39 = vperm.slane %v1995_v50, 0  ;;  %v2016_v24 = vmul.f32 %v1998_v15, %v4207_v1  ;;  %v4215_v41 = vld [vmem:[#allocation48_spill] sm:$0xff] }
 0x237   :  { %v2017_v16 = vmul.f32 %v1998_v15, %v4208_v60  ;;  %v2018_v63 = vmul.f32 %v1999_v26, %v4209_v27  ;;  %v2019_v17 = vmul.f32 %v1999_v26, %v4210_v49  ;;  %v2028_v30 = vadd.f32 %v2014_v47, %v2012_v54  ;;  %v4219_v54 = vld [vmem:[#allocation23_spill] sm:$0xff] }
 0x238   :  { %v2035_v21 = vadd.f32 %v2015_v6, %v2013_v10  ;;  %v1985_v20 = vadd.f32 %v1984_v35, %v1969_v51  ;;  %v2020_v52 = vmul.f32 %v2000_v7, %v4211_v45  ;;  %v2021_v3 = vmul.f32 %v2000_v7, %v4149_v46  ;;  %v4217_v35 = vld [vmem:[#allocation19_spill] sm:$0xff] }
 0x239   :  { %v2043_v57 = vrot.slane %v3760_v44, 1  ;;  %v2022_v31 = vmul.f32 %v2001_v59, %v4212_v61  ;;  %v2023_v36 = vmul.f32 %v2001_v59, %v4213_v22  ;;  %v2029_v2 = vadd.f32 %v2028_v30, %v2016_v24  ;;  %v4220_v24 = vld [vmem:[#allocation18_spill] sm:$0xff] }
 0x23a   :  { %v2036_v53 = vadd.f32 %v2035_v21, %v2017_v16  ;;  %v1979_v13 = vadd.f32 %v1978_v32, %v1970_v38  ;;  %v2024_v12 = vmul.f32 %v2002_v25, %v4214_v43  ;;  %v2044_v28 = vrot.slane %v3760_v44, 2  ;;  %v4223_v21 = vld [vmem:[#allocation24_spill] sm:$0xff] }
 0x23b   :  { %v2045_v19 = vrot.slane %v3760_v44, 3  ;;  %v2030_v51 = vadd.f32 %v2029_v2, %v2018_v63  ;;  %v2046_v55 = vrot.slane %v3760_v44, 4  ;;  %v2051_v46 = vperm.slane %v2043_v57, 0  ;;  %v4221_v63 = vld [vmem:[#allocation22_spill] sm:$0xff] }
 0x23c   :  { %v2037_v4 = vadd.f32 %v2036_v53, %v2019_v17  ;;  %v1986_v11 = vadd.f32 %v1985_v20, %v1971_v8  ;;  %v2025_v50 = vmul.f32 %v2002_v25, %v4215_v41  ;;  %v2047_v15 = vrot.slane %v3760_v44, 5  ;;  %v4218_v8 = vld [vmem:[#allocation49_spill] sm:$0xff]  ;;  %v4222_v17 = vld [vmem:[#allocation20_spill] sm:$0xff]  ;;  %v4226_v57 = vld [vmem:[#allocation50_spill] sm:$0xff] }
 0x23d   :  { %v2050_v40 = vperm.slane %v3760_v44, 0  ;;  %v2031_v26 = vadd.f32 %v2030_v51, %v2020_v52  ;;  %v2048_v58 = vrot.slane %v3760_v44, 6  ;;  %v2049_v47 = vrot.slane %v3760_v44, 7  ;;  %v4224_v20 = vld [vmem:[#allocation21_spill] sm:$0xff] }
 0x23e   :  { %v2038_v38 = vadd.f32 %v2037_v4, %v2021_v3  ;;  %v2026_v6 = vmul.f32 %v2003_v39, %v4216_v56  ;;  %v2052_v48 = vperm.slane %v2044_v28, 0  ;;  %v2053_v0 = vperm.slane %v2045_v19, 0  ;;  %v4225_v52 = vld [vmem:[#allocation25_spill] sm:$0xff] }
 0x23f   :  { %v2068_v7 = vmul.f32 %v2051_v46, %v4217_v35  ;;  %v3801_v59 = vadd.f32 %v1979_v13, %v1972_v18  ;;  %v2027_v25 = vmul.f32 %v2003_v39, %v4218_v8  ;;  %v2054_v33 = vperm.slane %v2046_v55, 0  ;;  %v4231_v8 = vld [vmem:[#allocation31_spill] sm:$0xff] }
 0x240   :  { %v2069_v62 = vmul.f32 %v2051_v46, %v4219_v54  ;;  %v1987_v10 = vadd.f32 %v1986_v11, %v1973_v29  ;;  %v2032_v32 = vadd.f32 %v2031_v26, %v2022_v31  ;;  %v2055_v1 = vperm.slane %v2047_v15, 0  ;;  %v4229_v26 = vld [vmem:[#allocation57_spill] sm:$0xff] }
 0x241   :  { %v2066_v60 = vmul.f32 %v2050_v40, %v4220_v24  ;;  %v2039_v16 = vadd.f32 %v2038_v38, %v2023_v36  ;;  %v2056_v44 = vperm.slane %v2048_v58, 0  ;;  %v2057_v27 = vperm.slane %v2049_v47, 0  ;;  %v4227_v36 = vld [vmem:[#allocation53_spill] sm:$0xff] }
 0x242   :  { %v2067_v49 = vmul.f32 %v2050_v40, %v4221_v63  ;;  %v2070_v30 = vmul.f32 %v2052_v48, %v4222_v17  ;;  %v2071_v18 = vmul.f32 %v2052_v48, %v4223_v21  ;;  %v2072_v45 = vmul.f32 %v2053_v0, %v4224_v20  ;;  %v4235_v17 = vld [vmem:[#allocation32_spill] sm:$0xff]  ;;  %v4236_v21 = vld [vmem:[#allocation29_spill] sm:$0xff] }
 0x243   :  { %v2082_v39 = vadd.f32 %v2068_v7, %v2066_v60  ;;  %v2073_v3 = vmul.f32 %v2053_v0, %v4225_v52  ;;  %v2074_v29 = vmul.f32 %v2054_v33, %v4226_v57  ;;  %v2097_v31 = vrot.slane %v3762_v5, 1  ;;  %v4230_v7 = vld [vmem:[#allocation27_spill] sm:$0xff] }
 0x244   :  { %v2089_v61 = vadd.f32 %v2069_v62, %v2067_v49  ;;  %v2033_v22 = vadd.f32 %v2032_v32, %v2024_v12  ;;  %v2075_v2 = vmul.f32 %v2054_v33, %v4227_v36  ;;  %v2076_v53 = vmul.f32 %v2055_v1, %v4165_v14  ;;  %v4228_v12 = vld [vmem:[#allocation54_spill] sm:$0xff]  ;;  %v4234_v49 = vld [vmem:[#allocation28_spill] sm:$0xff] }
 0x245   :  { %v2083_v13 = vadd.f32 %v2082_v39, %v2070_v30  ;;  %v2040_v43 = vadd.f32 %v2039_v16, %v2025_v50  ;;  %v2098_v19 = vrot.slane %v3762_v5, 2  ;;  %v2099_v51 = vrot.slane %v3762_v5, 3  ;;  %v4232_v16 = vld [vmem:[#allocation26_spill] sm:$0xff] }
 0x246   :  { %v2090_v28 = vadd.f32 %v2089_v61, %v2071_v18  ;;  %v2077_v4 = vmul.f32 %v2055_v1, %v4166_v37  ;;  %v2078_v55 = vmul.f32 %v2056_v44, %v4169_v42  ;;  %v2105_v11 = vperm.slane %v2097_v31, 0  ;;  %v4237_v61 = vld [vmem:[#allocation33_spill] sm:$0xff] }
 0x247   :  { %v2084_v46 = vadd.f32 %v2083_v13, %v2072_v45  ;;  %v2079_v41 = vmul.f32 %v2056_v44, %v4170_v23  ;;  %v2080_v15 = vmul.f32 %v2057_v27, %v4228_v12  ;;  %v2100_v14 = vrot.slane %v3762_v5, 4 }
 0x248   :  { %v2091_v40 = vadd.f32 %v2090_v28, %v2073_v3  ;;  %v2081_v50 = vmul.f32 %v2057_v27, %v4229_v26  ;;  %v2101_v58 = vrot.slane %v3762_v5, 5  ;;  %v2104_v47 = vperm.slane %v3762_v5, 0 }
 0x249   :  { %v2085_v38 = vadd.f32 %v2084_v46, %v2074_v29  ;;  %v2034_v56 = vadd.f32 %v2033_v22, %v2026_v6  ;;  %v2106_v48 = vperm.slane %v2098_v19, 0  ;;  %v2107_v42 = vperm.slane %v2099_v51, 0  ;;  %v4233_v6 = vld [vmem:[#allocation30_spill] sm:$0xff] }
 0x24a   :  { %v2092_v37 = vadd.f32 %v2091_v40, %v2075_v2  ;;  %v2041_v0 = vadd.f32 %v2040_v43, %v2027_v25  ;;  %v2122_v23 = vmul.f32 %v2105_v11, %v4230_v7  ;;  %v2123_v33 = vmul.f32 %v2105_v11, %v4231_v8  ;;  %v4238_v19 = vld [vmem:[#allocation58_spill] sm:$0xff] }
 0x24b   :  { %v2086_v35 = vadd.f32 %v2085_v38, %v2076_v53  ;;  %v2102_v62 = vrot.slane %v3762_v5, 6  ;;  %v2103_v32 = vrot.slane %v3762_v5, 7  ;;  %v2108_v1 = vperm.slane %v2100_v14, 0  ;;  %v4241_v14 = vld [vmem:[#allocation62_spill] sm:$0xff] }
 0x24c   :  { %v2093_v54 = vadd.f32 %v2092_v37, %v2077_v4  ;;  %v2109_v60 = vperm.slane %v2101_v58, 0  ;;  %v2120_v44 = vmul.f32 %v2104_v47, %v4232_v16  ;;  %v2121_v27 = vmul.f32 %v2104_v47, %v4233_v6  ;;  %v4239_v4 = vld [vmem:[#allocation61_spill] sm:$0xff]  ;;  %v4242_v37 = vld [vmem:[#allocation60_spill] sm:$0xff] }
 0x24d   :  { %v2087_v24 = vadd.f32 %v2086_v35, %v2078_v55  ;;  %v2124_v25 = vmul.f32 %v2106_v48, %v4234_v49  ;;  %v2125_v30 = vmul.f32 %v2106_v48, %v4235_v17  ;;  %v2126_v18 = vmul.f32 %v2107_v42, %v4236_v21 }
 0x24e   :  { %v2094_v63 = vadd.f32 %v2093_v54, %v2079_v41  ;;  %v2136_v45 = vadd.f32 %v2122_v23, %v2120_v44  ;;  %v2143_v39 = vadd.f32 %v2123_v33, %v2121_v27  ;;  %v2150_v5 = vmul.f32 %v3801_v59, %v3801_v59 }
 0x24f   :  { %v2088_v20 = vadd.f32 %v2087_v24, %v2080_v15  ;;  %v2151_v3 = vmul.f32 %v1987_v10, %v1987_v10  ;;  %v2159_v57 = vmul.f32 %v2034_v56, %v2034_v56  ;;  %v2160_v29 = vmul.f32 %v2041_v0, %v2041_v0  ;;  %v4240_v15 = vld [vmem:[#allocation59_spill] sm:$0xff] }
 0x250   :  { %v2095_v52 = vadd.f32 %v2094_v63, %v2081_v50  ;;  %v2127_v31 = vmul.f32 %v2107_v42, %v4237_v61  ;;  %v2137_v22 = vadd.f32 %v2136_v45, %v2124_v25  ;;  %v2144_v36 = vadd.f32 %v2143_v39, %v2125_v30  ;;  %v4243_v42 = vld [vmem:[#allocation63_spill] sm:$0xff] }
 0x251   :  { %v2168_v2 = vmul.f32 %v2088_v20, %v2088_v20  ;;  %v2110_v53 = vperm.slane %v2102_v62, 0  ;;  %v2152_v13 = vadd.f32 %v2151_v3, %v2150_v5  ;;  %v2161_v43 = vadd.f32 %v2160_v29, %v2159_v57 }
 0x252   :  { %v2169_v28 = vmul.f32 %v2095_v52, %v2095_v52  ;;  %v2128_v51 = vmul.f32 %v2108_v1, %v4238_v19  ;;  %v2129_v55 = vmul.f32 %v2108_v1, %v4239_v4  ;;  %v2138_v46 = vadd.f32 %v2137_v22, %v2126_v18 }
 0x253   :  { %v2145_v11 = vadd.f32 %v2144_v36, %v2127_v31  ;;  %v2111_v59 = vperm.slane %v2103_v32, 0  ;;  %v2153_v41 = vrot.slane %v2152_v13, 4  ;;  %v2162_v10 = vrot.slane %v2161_v43, 4 }
 0x254   :  { %v2170_v12 = vadd.f32 %v2169_v28, %v2168_v2  ;;  %v2130_v40 = vmul.f32 %v2109_v60, %v4240_v15  ;;  %v2131_v26 = vmul.f32 %v2109_v60, %v4241_v14  ;;  %v2139_v50 = vadd.f32 %v2138_v46, %v2128_v51 }
 0x255   :  { %v2146_v38 = vadd.f32 %v2145_v11, %v2129_v55  ;;  %v2154_v58 = vadd.f32 %v2153_v41, %v2152_v13  ;;  %v2163_v47 = vadd.f32 %v2162_v10, %v2161_v43  ;;  %v2132_v48 = vmul.f32 %v2110_v53, %v4242_v37 }
 0x256   :  { %v2171_v56 = vrot.slane %v2170_v12, 4  ;;  %v2133_v0 = vmul.f32 %v2110_v53, %v4243_v42  ;;  %v2140_v35 = vadd.f32 %v2139_v50, %v2130_v40  ;;  %v2134_v54 = vmul.f32 %v2111_v59, %v3094_v9 }
 0x257   :  { %v2147_v7 = vadd.f32 %v2146_v38, %v2131_v26  ;;  %v2155_v23 = vrot.slane %v2154_v58, 2  ;;  %v2164_v8 = vrot.slane %v2163_v47, 2  ;;  %v2135_v62 = vmul.f32 %v2111_v59, %v4140_v34 }
 0x258   :  { %v2172_v33 = vadd.f32 %v2171_v56, %v2170_v12  ;;  %v2141_v32 = vadd.f32 %v2140_v35, %v2132_v48 }
 0x259   :  { %v2148_v1 = vadd.f32 %v2147_v7, %v2133_v0  ;;  %v2156_v44 = vadd.f32 %v2155_v23, %v2154_v58  ;;  %v2165_v6 = vadd.f32 %v2164_v8, %v2163_v47 }
 0x25a   :  { %v2173_v24 = vrot.slane %v2172_v33, 2  ;;  %v2142_v60 = vadd.f32 %v2141_v32, %v2134_v54 }
 0x25b   :  { %v2149_v16 = vadd.f32 %v2148_v1, %v2135_v62  ;;  %v2157_v25 = vrot.slane %v2156_v44, 1  ;;  %v2166_v17 = vrot.slane %v2165_v6, 1 }
 0x25c   :  { %v2177_v27 = vmul.f32 %v2142_v60, %v2142_v60  ;;  %v2174_v49 = vadd.f32 %v2173_v24, %v2172_v33 }
 0x25d   :  { %v2178_v63 = vmul.f32 %v2149_v16, %v2149_v16  ;;  %v2158_v20 = vadd.f32 %v2157_v25, %v2156_v44  ;;  %v2167_v45 = vadd.f32 %v2166_v17, %v2165_v6 }
 0x25e   :  { %v2175_v18 = vrot.slane %v2174_v49, 1 }
 0x25f   :  { %v2179_v30 = vadd.f32 %v2178_v63, %v2177_v27  ;;  %v2187_v52 = vsel %vm2186_vm5, %v2158_v20, %v2167_v45 }
 0x260   :  { %v2176_v39 = vadd.f32 %v2175_v18, %v2174_v49 }
 0x261   :  { %v2180_v21 = vrot.slane %v2179_v30, 4 }
 0x262   :  { %v2189_v57 = vsel %vm2188_vm6, %v2187_v52, %v2176_v39 }
 0x263   :  { %v2181_v9 = vadd.f32 %v2180_v21, %v2179_v30 }
 0x265   :  { %v2182_v34 = vrot.slane %v2181_v9, 2 }
 0x267   :  { %v2183_v5 = vadd.f32 %v2182_v34, %v2181_v9 }
 0x269   :  { %v2184_v3 = vrot.slane %v2183_v5, 1 }
 0x26b   :  { %v2185_v29 = vadd.f32 %v2184_v3, %v2183_v5 }
 0x26d   :  { %v2191_v61 = vsel %vm2190_vm13, %v2189_v57, %v2185_v29 }
 0x26e   :  { %2549 = vrsqrt.f32 %v2191_v61  ;;  %v2208_v31 = vadd.f32 1e-08, %v2191_v61  ;;  %v2192_v36 = vadd.f32 1.0, %v2191_v61  ;;  %vm2202_vm9 = vcmp.eq.f32.partialorder %v2191_v61, inf }
 0x26f   :  { %v2205_v41 = vand.u32 2147483648, %v2191_v61  ;;  %vm2204_vm11 = vcmp.eq.f32.partialorder %v2191_v61, 0.0 }
 0x270   :  { %2551 = vrsqrt.f32 %v2208_v31  ;;  %vm2215_vm12 = vweird.f32 %v2208_v31 }
 0x271   :  { %2553 = vrcp.f32 %v2192_v36 }
 0x274   :  { %v2550_v22 = vpop.eup %2549 }
 0x275   :  { %v2196_v2 = vmul.f32 %v2550_v22, %v2191_v61 }
 0x276   :  { %v2552_v53 = vpop.eup %2551 }
 0x277   :  { %v2197_v13 = vmul.f32 %v2550_v22, %v2196_v2  ;;  %v2210_v43 = vmul.f32 %v2552_v53, %v2208_v31  ;;  %v2554_v46 = vpop.eup %2553  ;;  %vm2216_vm10 = vweird.f32 %v2552_v53 }
 0x278   :  { %v2194_v12 = vmul.f32 %v2554_v46, %v2191_v61  ;;  %vm2217_vm14 = vmor %vm2215_vm12, %vm2216_vm10 }
 0x279   :  { %v2198_v28 = vmul.f32 0.5, %v2197_v13  ;;  %v2211_v19 = vmul.f32 %v2552_v53, %v2210_v43 }
 0x27b   :  { %v2199_v51 = vsub.f32 1.5, %v2198_v28  ;;  %v2212_v4 = vmul.f32 0.5, %v2211_v19 }
 0x27d   :  { %v2200_v55 = vmul.f32 %v2550_v22, %v2199_v51  ;;  %v2213_v11 = vsub.f32 1.5, %v2212_v4 }
 0x27f   :  { %v2201_v59 = vmul.f32 %v2200_v55, %v2191_v61  ;;  %v2214_v10 = vmul.f32 %v2552_v53, %v2213_v11 }
 0x281   :  { %v2203_v15 = vsel %vm2202_vm9, %v2191_v61, %v2201_v59  ;;  %v2218_v26 = vsel %vm2217_vm14, %v2552_v53, %v2214_v10 }
 0x282   :  { %v2206_v40 = vsel %vm2204_vm11, %v2205_v41, %v2203_v15 }
 0x283   :  { %v2207_v14 = vmul.f32 %v2206_v40, %v2194_v12 }
 0x285   :  { %v2219_v50 = vmul.f32 %v2218_v26, %v2207_v14 }
 0x287   :  { %2220 = vst [vmem:[%s3850_s2] sm:$0xf] %v2219_v50 }

</bundles_post_ra>
